<compile_context>
chip_gen: v7x
topology: tpu7x:2x2x1
jax: 0.10.0
libtpu: 0.0.40
codegen_flags: <defaults>
</compile_context>

<pallas_src>
import functools
import math

import jax
import jax.numpy as jnp
from jax.experimental import pallas as pl
from jax.experimental.pallas import tpu as pltpu

LANE = 128


# ---------------------------------------------------------------------------
# Pass 1: degrees, compact adjacency copy, transformed features
#   d = rsqrt(rowsum(A)),  adj_q = int8(A),  m = bf16(d * (x @ W))
# ---------------------------------------------------------------------------
def _degree_xw_kernel(adj_ref, x_ref, w_ref, d_ref, m_ref, adj_q_ref, rs_ref):
    k = pl.program_id(1)

    @pl.when(k == 0)
    def _():
        rs_ref[...] = jnp.zeros_like(rs_ref)

    a = adj_ref[...]
    # Widening reduce: accumulate row degrees in f32 without materializing a
    # full tm x tk f32 temporary of the tile.
    rs_ref[...] += jnp.sum(a, axis=1, keepdims=True, dtype=jnp.float32)
    # Compact adjacency copy for pass 2 (0/1 entries are exact in int8).
    adj_q_ref[...] = a.astype(adj_q_ref.dtype)

    @pl.when(k == pl.num_programs(1) - 1)
    def _():
        rs = rs_ref[...]                                       # (tm, 1)
        d = jnp.where(rs > 0.0, jax.lax.rsqrt(rs), 0.0)        # inf -> 0
        d_ref[...] = d
        xw = jnp.dot(x_ref[...], w_ref[...],
                     preferred_element_type=jnp.float32)       # once per i
        m_ref[...] = (d * xw).astype(m_ref.dtype)              # bf16


# ---------------------------------------------------------------------------
# Pass 2: aggregation   out = d * (A @ m)
#   m fully VMEM-resident (DMA'd once); accumulate directly into out block.
# ---------------------------------------------------------------------------
def _aggregate_resident_kernel(adj_ref, m_ref, d_ref, out_ref, *, tk):
    k = pl.program_id(1)

    @pl.when(k == 0)
    def _():
        out_ref[...] = jnp.zeros_like(out_ref)

    a = adj_ref[...].astype(jnp.bfloat16)                      # int8 -> bf16
    start = pl.multiple_of(k * tk, tk)
    m_tile = m_ref[pl.ds(start, tk), :]                        # bf16 slice
    out_ref[...] += jnp.dot(a, m_tile, preferred_element_type=jnp.float32)

    @pl.when(k == pl.num_programs(1) - 1)
    def _():
        out_ref[...] *= d_ref[...]


# Fallback when m does not fit VMEM-resident: m streamed per k block.
def _aggregate_blocked_kernel(adj_ref, m_ref, d_ref, out_ref):
    k = pl.program_id(1)

    @pl.when(k == 0)
    def _():
        out_ref[...] = jnp.zeros_like(out_ref)

    a = adj_ref[...].astype(jnp.bfloat16)
    out_ref[...] += jnp.dot(a, m_ref[...], preferred_element_type=jnp.float32)

    @pl.when(k == pl.num_programs(1) - 1)
    def _():
        out_ref[...] *= d_ref[...]


# ---------------------------------------------------------------------------
# Wrapper
# ---------------------------------------------------------------------------
def graph_convolution(x, adj, weight, *, tm=512, tk=512,
                      adj_compact_dtype=jnp.int8):
    """GCN forward: D^{-1/2} A D^{-1/2} (x W) with dense adjacency."""
    N = adj.shape[0]
    c_in, c_out = weight.shape
    assert x.shape == (N, c_in) and adj.shape == (N, N)

    tm = min(tm, N)
    tk = min(tk, N)
    assert N % tm == 0 and N % tk == 0, "demo requires N divisible by tiles"
    assert tm % 32 == 0 and tk % 128 == 0, "tile sizes must respect TPU tiling"

    c_in_p = pl.cdiv(c_in, LANE) * LANE
    c_out_p = pl.cdiv(c_out, LANE) * LANE

    # Lane-dense padding of the channel dims (zero padding is exact / cheap).
    x_p = jnp.zeros((N, c_in_p), jnp.float32).at[:, :c_in].set(
        x.astype(jnp.float32))
    w_p = jnp.zeros((c_in_p, c_out_p), jnp.float32).at[:c_in, :c_out].set(
        weight.astype(jnp.float32))

    grid = (N // tm, N // tk)
    q_bytes = jnp.dtype(adj_compact_dtype).itemsize
    adj_bytes = jnp.dtype(adj.dtype).itemsize

    def _cparams(vmem_estimate):
        kwargs = dict(dimension_semantics=("parallel", "arbitrary"))
        # Only set the scoped-VMEM limit when the estimate exceeds the
        # smallest default (16 MiB on v5e); cap below v7x's 64 MiB physical.
        if vmem_estimate > (16 << 20):
            kwargs["vmem_limit_bytes"] = min(
                int(vmem_estimate * 1.25) + (4 << 20), 60 << 20)
        return pltpu.CompilerParams(**kwargs)

    # --- pass 1: d, m = bf16(d * (x @ W)), adj_q = int8(adj) ----------------
    vmem1 = 2 * (tm * tk * adj_bytes + tm * c_in_p * 4 + c_in_p * c_out_p * 4
                 + tm * tk * q_bytes + tm * c_out_p * 2 + tm * 4) + tm * 4

    d, m, adj_q = pl.pallas_call(
        _degree_xw_kernel,
        out_shape=(jax.ShapeDtypeStruct((N, 1), jnp.float32),
                   jax.ShapeDtypeStruct((N, c_out_p), jnp.bfloat16),
                   jax.ShapeDtypeStruct((N, N), adj_compact_dtype)),
        grid=grid,
        in_specs=[
            pl.BlockSpec((tm, tk), lambda i, k: (i, k)),           # adj tile
            pl.BlockSpec((tm, c_in_p), lambda i, k: (i, 0)),       # x rows
            pl.BlockSpec((c_in_p, c_out_p), lambda i, k: (0, 0)),  # W
        ],
        out_specs=(pl.BlockSpec((tm, 1), lambda i, k: (i, 0)),
                   pl.BlockSpec((tm, c_out_p), lambda i, k: (i, 0)),
                   pl.BlockSpec((tm, tk), lambda i, k: (i, k))),
        scratch_shapes=[pltpu.VMEM((tm, 1), jnp.float32)],
        compiler_params=_cparams(vmem1),
    )(adj, x_p, w_p)

    # --- pass 2: out = d * (adj_q @ m) ---------------------------------------
    base2 = 2 * (tm * tk * q_bytes + tm * c_out_p * 4 + tm * 4)
    m_resident_bytes = 2 * N * c_out_p * 2          # x2 for double buffering
    m_resident = (base2 + m_resident_bytes) <= (28 << 20)

    if m_resident:
        vmem2 = base2 + m_resident_bytes
        kernel2 = functools.partial(_aggregate_resident_kernel, tk=tk)
        m_spec = pl.BlockSpec((N, c_out_p), lambda i, k: (0, 0))   # DMA once
    else:
        vmem2 = base2 + 2 * tk * c_out_p * 2
        kernel2 = _aggregate_blocked_kernel
        m_spec = pl.BlockSpec((tk, c_out_p), lambda i, k: (k, 0))

    out_p = pl.pallas_call(
        kernel2,
        out_shape=jax.ShapeDtypeStruct((N, c_out_p), jnp.float32),
        grid=grid,
        in_specs=[
            pl.BlockSpec((tm, tk), lambda i, k: (i, k)),           # adj_q tile
            m_spec,                                                # m
            pl.BlockSpec((tm, 1), lambda i, k: (i, 0)),            # d rows
        ],
        out_specs=pl.BlockSpec((tm, c_out_p), lambda i, k: (i, 0)),
        compiler_params=_cparams(vmem2),
    )(adj_q, m, d)

    return out_p[:, :c_out]


# ---------------------------------------------------------------------------
# Reference (pure JAX, f32, highest precision)
# ---------------------------------------------------------------------------
def reference(x, adj, weight):
    hi = jax.lax.Precision.HIGHEST
    row_sum = jnp.sum(adj, axis=1)
    d = jnp.where(row_sum > 0.0, row_sum ** -0.5, 0.0)
    adj_norm = d[:, None] * adj * d[None, :]
    m = jnp.dot(x, weight, precision=hi)
    return jnp.dot(adj_norm, m, precision=hi)


if __name__ == "__main__":
    # Small synthetic problem: N=256 nodes, in_channels=32, out_channels=32.
    N, C_IN, C_OUT = 256, 32, 32

    key = jax.random.PRNGKey(0)
    k_x, k_adj, k_w, k_b = jax.random.split(key, 4)

    # Node features.
    x = jax.random.normal(k_x, (N, C_IN), dtype=jnp.float32)

    # Dense 0/1 adjacency (symmetric, self-loops) standing in for the sparse
    # COO tensor of the PyTorch module (identical forward semantics).
    a = (jax.random.uniform(k_adj, (N, N)) < 0.15).astype(jnp.float32)
    adj = jnp.clip(a + a.T + jnp.eye(N, dtype=jnp.float32), 0.0, 1.0)

    # Parameter init mirroring reset_parameters(): uniform(-stdv, stdv),
    # stdv = 1/sqrt(out_channels).
    stdv = 1.0 / math.sqrt(C_OUT)
    weight = jax.random.uniform(k_w, (C_IN, C_OUT), jnp.float32,
                                minval=-stdv, maxval=stdv)
    bias = jax.random.uniform(k_b, (C_OUT,), jnp.float32,
                              minval=-stdv, maxval=stdv)
    del bias  # created by the module but never used in forward()

    out = graph_convolution(x, adj, weight)
    out = jax.block_until_ready(out)

    ref = reference(x, adj, weight)
    assert out.shape == (N, C_OUT)
    # m is quantized to bf16 for the fast MXU path -> compare at bf16-level
    # tolerance (accumulation stays f32).
    assert jnp.allclose(out, ref, atol=1e-2, rtol=1e-2), "mismatch vs reference"

    print("KERNEL_OK")
</pallas_src>

<mosaic_0001>
module attributes {stable_mosaic.version = 11 : i64} {
  func.func @_degree_xw_kernel(%arg0: i32, %arg1: i32, %arg2: memref<256x256xf32, #tpu.memory_space<vmem>>, %arg3: memref<256x128xf32, #tpu.memory_space<vmem>>, %arg4: memref<128x128xf32, #tpu.memory_space<vmem>>, %arg5: memref<256x1xf32, #tpu.memory_space<vmem>>, %arg6: memref<256x128xbf16, #tpu.memory_space<vmem>>, %arg7: memref<256x256xi8, #tpu.memory_space<vmem>>, %arg8: memref<256x1xf32, #tpu.memory_space<vmem>>) attributes {dimension_semantics = [#tpu.dimension_semantics<parallel>, #tpu.dimension_semantics<arbitrary>], iteration_bounds = array<i64: 1, 1>, scalar_prefetch = 0 : i64, scratch_operands = 1 : i64, tpu.core_type = #tpu.core_type<tc>, window_params = [{transform_indices = @transform_0, window_bounds = array<i64: 256, 256>}, {transform_indices = @transform_1, window_bounds = array<i64: 256, 128>}, {pipeline_mode = #tpu.pipeline_mode<synchronous>, transform_indices = @transform_2, window_bounds = array<i64: 128, 128>}, {transform_indices = @transform_3, window_bounds = array<i64: 256, 1>}, {transform_indices = @transform_4, window_bounds = array<i64: 256, 128>}, {transform_indices = @transform_5, window_bounds = array<i64: 256, 256>}]} {
    %c0_i32 = arith.constant 0 : i32
    %0 = arith.cmpi eq, %arg1, %c0_i32 : i32
    %1 = arith.extui %0 : i1 to i32
    %c0_i32_0 = arith.constant 0 : i32
    %2 = arith.cmpi ne, %1, %c0_i32_0 : i32
    scf.if %2 {
      %cst_10 = arith.constant 0.000000e+00 : f32
      %14 = vector.broadcast %cst_10 : f32 to vector<256x1xf32>
      %c0_11 = arith.constant 0 : index
      %c0_12 = arith.constant 0 : index
      %15 = vector.load %arg8[%c0_11, %c0_12] : memref<256x1xf32, #tpu.memory_space<vmem>>, vector<256x1xf32>
      tpu.vector_store %arg8[%c0_11, %c0_12], %14 {strides = array<i32>} : memref<256x1xf32, #tpu.memory_space<vmem>>, vector<256x1xf32>,
    } else {
    }
    %c0 = arith.constant 0 : index
    %c0_1 = arith.constant 0 : index
    %3 = vector.load %arg2[%c0, %c0_1] : memref<256x256xf32, #tpu.memory_space<vmem>>, vector<256x256xf32>
    %c0_2 = arith.constant 0 : index
    %c0_3 = arith.constant 0 : index
    %4 = vector.load %arg8[%c0_2, %c0_3] : memref<256x1xf32, #tpu.memory_space<vmem>>, vector<256x1xf32>
    %cst = arith.constant dense<0.000000e+00> : vector<256xf32>
    %5 = vector.multi_reduction <add>, %3, %cst [1] : vector<256x256xf32> to vector<256xf32>
    %6 = vector.shape_cast %5 : vector<256xf32> to vector<256x1xf32>
    %7 = arith.addf %4, %6 : vector<256x1xf32>
    %c0_4 = arith.constant 0 : index
    %c0_5 = arith.constant 0 : index
    %8 = vector.load %arg8[%c0_4, %c0_5] : memref<256x1xf32, #tpu.memory_space<vmem>>, vector<256x1xf32>
    tpu.vector_store %arg8[%c0_4, %c0_5], %7 {strides = array<i32>} : memref<256x1xf32, #tpu.memory_space<vmem>>, vector<256x1xf32>,
    %9 = arith.fptosi %3 : vector<256x256xf32> to vector<256x256xi8>
    %c0_6 = arith.constant 0 : index
    %c0_7 = arith.constant 0 : index
    %10 = vector.load %arg7[%c0_6, %c0_7] : memref<256x256xi8, #tpu.memory_space<vmem>>, vector<256x256xi8>
    tpu.vector_store %arg7[%c0_6, %c0_7], %9 {strides = array<i32>} : memref<256x256xi8, #tpu.memory_space<vmem>>, vector<256x256xi8>,
    %c0_i32_8 = arith.constant 0 : i32
    %11 = arith.cmpi eq, %arg1, %c0_i32_8 : i32
    %12 = arith.extui %11 : i1 to i32
    %c0_i32_9 = arith.constant 0 : i32
    %13 = arith.cmpi ne, %12, %c0_i32_9 : i32
    scf.if %13 {
      %c0_10 = arith.constant 0 : index
      %c0_11 = arith.constant 0 : index
      %14 = vector.load %arg8[%c0_10, %c0_11] : memref<256x1xf32, #tpu.memory_space<vmem>>, vector<256x1xf32>
      %cst_12 = arith.constant 0.000000e+00 : f32
      %15 = vector.broadcast %cst_12 : f32 to vector<256x1xf32>
      %16 = arith.cmpf ogt, %14, %15 : vector<256x1xf32>
      %17 = math.rsqrt %14 : vector<256x1xf32>
      %cst_13 = arith.constant 0.000000e+00 : f32
      %18 = vector.broadcast %cst_13 : f32 to vector<256x1xf32>
      %19 = arith.select %16, %17, %18 : vector<256x1xi1>, vector<256x1xf32>
      %c0_14 = arith.constant 0 : index
      %c0_15 = arith.constant 0 : index
      %20 = vector.load %arg5[%c0_14, %c0_15] : memref<256x1xf32, #tpu.memory_space<vmem>>, vector<256x1xf32>
      tpu.vector_store %arg5[%c0_14, %c0_15], %19 {strides = array<i32>} : memref<256x1xf32, #tpu.memory_space<vmem>>, vector<256x1xf32>,
      %c0_16 = arith.constant 0 : index
      %c0_17 = arith.constant 0 : index
      %21 = vector.load %arg3[%c0_16, %c0_17] : memref<256x128xf32, #tpu.memory_space<vmem>>, vector<256x128xf32>
      %c0_18 = arith.constant 0 : index
      %c0_19 = arith.constant 0 : index
      %22 = vector.load %arg4[%c0_18, %c0_19] : memref<128x128xf32, #tpu.memory_space<vmem>>, vector<128x128xf32>
      %cst_20 = arith.constant dense<0.000000e+00> : vector<256x128xf32>
      %23 = tpu.matmul %21, %22, %cst_20 {dimension_numbers = #tpu.dot_dimension_numbers<[1], [0], [0], [1], [0, 0, 1, 1], [], []>} : vector<256x128xf32>, vector<128x128xf32>, vector<256x128xf32> -> vector<256x128xf32>
      %24 = vector.broadcast %19 : vector<256x1xf32> to vector<256x128xf32>
      %25 = arith.mulf %24, %23 : vector<256x128xf32>
      %26 = arith.truncf %25 : vector<256x128xf32> to vector<256x128xbf16>
      %c0_21 = arith.constant 0 : index
      %c0_22 = arith.constant 0 : index
      %27 = vector.load %arg6[%c0_21, %c0_22] : memref<256x128xbf16, #tpu.memory_space<vmem>>, vector<256x128xbf16>
      tpu.vector_store %arg6[%c0_21, %c0_22], %26 {strides = array<i32>} : memref<256x128xbf16, #tpu.memory_space<vmem>>, vector<256x128xbf16>,
    } else {
    }
    return
  }
  func.func @transform_0(%arg0: i32, %arg1: i32) -> (i32, i32) {
    %c0_i32 = arith.constant 0 : i32
    return %arg0, %arg1 : i32, i32
  }
  func.func @transform_1(%arg0: i32, %arg1: i32) -> (i32, i32) {
    %c0_i32 = arith.constant 0 : i32
    %c0_i32_0 = arith.constant 0 : i32
    return %arg0, %c0_i32 : i32, i32
  }
  func.func @transform_2(%arg0: i32, %arg1: i32) -> (i32, i32) {
    %c0_i32 = arith.constant 0 : i32
    %c0_i32_0 = arith.constant 0 : i32
    %c0_i32_1 = arith.constant 0 : i32
    return %c0_i32, %c0_i32_0 : i32, i32
  }
  func.func @transform_3(%arg0: i32, %arg1: i32) -> (i32, i32) {
    %c0_i32 = arith.constant 0 : i32
    %c0_i32_0 = arith.constant 0 : i32
    return %arg0, %c0_i32 : i32, i32
  }
  func.func @transform_4(%arg0: i32, %arg1: i32) -> (i32, i32) {
    %c0_i32 = arith.constant 0 : i32
    %c0_i32_0 = arith.constant 0 : i32
    return %arg0, %c0_i32 : i32, i32
  }
  func.func @transform_5(%arg0: i32, %arg1: i32) -> (i32, i32) {
    %c0_i32 = arith.constant 0 : i32
    return %arg0, %arg1 : i32, i32
  }
}

</mosaic_0001>

<bundles_post_ra>
// kernel: tpu_custom_call.1
= control target key start
LH: loop header
LB: loop body
LE: loop exit
PB: predicated region body
PF: predicated region fallthrough
CT: control target
= control target key end

     0   :  { %11 = vsyncpa [#allocation4], 0  ;;  %s2272_s0 = inlined_call_operand.hbm [shape: f32[256,256], index: 0, kind: input, shape index: {}]   ;;  %s2273_s1 = inlined_call_operand.hbm [shape: f32[256,128], index: 1, kind: input, shape index: {}]   ;;  %s2274_s2 = inlined_call_operand.hbm [shape: f32[128,128], index: 2, kind: input, shape index: {}]   ;;  %s2275_s3 = inlined_call_operand.vmem [shape: f32[256,1], index: 3, kind: output, shape index: {0}]   ;;  %s2276_s4 = inlined_call_operand.hbm [shape: bf16[256,128], index: 4, kind: output, shape index: {1}]   ;;  %s2277_s5 = inlined_call_operand.hbm [shape: s8[256,256], index: 5, kind: output, shape index: {2}]  }
   0x1   :  { %12 = vsyncpa [#allocation7], 0 }
   0x2   :  { %13 = vsyncpa [#allocation5], 0 }
   0x3   :  { %14 = vsyncpa [#allocation11], 0  ;;  %s1663_s18 = smov [#allocation6]   ;;  %s1545_s22 = scalar_lea.hbm %s2273_s1, 4096 }
   0x4   :  { %s32_s19 = sshll.u32 %s1663_s18, 4  ;;  %p1546_p0 = scmp.ne.s32.totalorder %s2273_s1, %s1545_s22  ;;  %s33_s19 = int_to_ptr.vmem [resolvable:$true] %s32_s19 }
   0x5   :  { %p1549_p1 = scmp.lt.u32.totalorder %s1545_s22, %s2273_s1 }
   0x7   :  { %p1551_p2 = pnand %p1549_p1, %p1546_p0 }
   0x9   :  { %1554 = shalt.err (!%p1551_p2)
}
   0xa   :  { %s1555_s27 = scalar_lea.vmem %s33_s19, 4096  ;;  %p1560_p4 = scmp.lt.s32.totalorder %s33_s19, %s33_s19 }
   0xb   :  { %p1556_p3 = scmp.ne.s32.totalorder %s33_s19, %s1555_s27  ;;  %p1561_p5 = scmp.lt.s32.totalorder %s1555_s27, %s1555_s27 }
   0xd   :  { %p1562_p6 = por %p1561_p5, %p1560_p4 }
   0xf   :  { %p1563_p7 = pnand %p1562_p6, %p1556_p3 }
  0x11   :  { %1566 = shalt.err (!%p1563_p7)
}
  0x12   :  { %s1664_s28 = smov 128   ;;  %s1665_s29 = smov 8  }
  0x13   :  { %38 = dma.hbm_to_vmem [thread:$0]  %s2273_s1, 4096, %s33_s19, [#allocation7], %s1664_s28, %s1664_s28, %s1665_s29  }
  0x14   :  { %s1666_s7 = smov [#allocation3]   ;;  %s1567_s11 = scalar_lea.hbm %s2272_s0, 8192 }
  0x15   :  { %s20_s8 = sshll.u32 %s1666_s7, 4  ;;  %p1568_p8 = scmp.ne.s32.totalorder %s2272_s0, %s1567_s11  ;;  %s21_s8 = int_to_ptr.vmem [resolvable:$true] %s20_s8 }
  0x16   :  { %p1571_p9 = scmp.lt.u32.totalorder %s1567_s11, %s2272_s0 }
  0x18   :  { %p1573_p10 = pnand %p1571_p9, %p1568_p8 }
  0x1a   :  { %1576 = shalt.err (!%p1573_p10)
}
  0x1b   :  { %s1577_s16 = scalar_lea.vmem %s21_s8, 8192  ;;  %p1582_p12 = scmp.lt.s32.totalorder %s21_s8, %s21_s8 }
  0x1c   :  { %p1578_p11 = scmp.ne.s32.totalorder %s21_s8, %s1577_s16  ;;  %p1583_p13 = scmp.lt.s32.totalorder %s1577_s16, %s1577_s16 }
  0x1e   :  { %p1584_p0 = por %p1583_p13, %p1582_p12 }
  0x20   :  { %p1585_p1 = pnand %p1584_p0, %p1578_p11 }
  0x22   :  { %1588 = shalt.err (!%p1585_p1)
}
  0x23   :  { %s1667_s1 = smov 256   ;;  %s1668_s17 = smov 16  }
  0x24   :  { %26 = dma.hbm_to_vmem [thread:$0]  %s2272_s0, 8192, %s21_s8, [#allocation4], %s1667_s1, %s1667_s1, %s1668_s17  }
  0x25   :  { %s1669_s20 = smov [#allocation8]   ;;  %s1589_s24 = scalar_lea.hbm %s2274_s2, 2048 }
  0x26   :  { %s44_s21 = sshll.u32 %s1669_s20, 4  ;;  %p1590_p2 = scmp.ne.s32.totalorder %s2274_s2, %s1589_s24  ;;  %s45_s21 = int_to_ptr.vmem [resolvable:$true] %s44_s21 }
  0x27   :  { %p1593_p3 = scmp.lt.u32.totalorder %s1589_s24, %s2274_s2 }
  0x29   :  { %p1595_p4 = pnand %p1593_p3, %p1590_p2 }
  0x2b   :  { %1598 = shalt.err (!%p1595_p4)
}
  0x2c   :  { %s1599_s6 = scalar_lea.vmem %s45_s21, 2048  ;;  %p1604_p6 = scmp.lt.s32.totalorder %s45_s21, %s45_s21 }
  0x2d   :  { %p1600_p5 = scmp.ne.s32.totalorder %s45_s21, %s1599_s6  ;;  %p1605_p7 = scmp.lt.s32.totalorder %s1599_s6, %s1599_s6 }
  0x2f   :  { %p1606_p8 = por %p1605_p7, %p1604_p6 }
  0x31   :  { %p1607_p9 = pnand %p1606_p8, %p1600_p5 }
  0x33   :  { %1610 = shalt.err (!%p1607_p9)
}
  0x34   :  { %50 = dma.hbm_to_vmem [thread:$0]  %s2274_s2, 2048, %s45_s21, [#allocation7], %s1664_s28, %s1664_s28, %s1665_s29  }
  0x35   :  { %1655 = dma.done.wait [#allocation4], 8192  }
  0x36   :  { %1656 = vsyncadd [#allocation4], 4294959104 }
  0x37   :  { %1657 = dma.done.wait [#allocation7], 6144  }
  0x38   :  { %1658 = vsyncadd [#allocation7], 4294961152  ;;  %vm64_vm0 = vcmask 7168   ;;  %v1670_v0 = vmov 0.0   ;;  %v101_v1 = vld [vmem:[#allocation3 + $0x20] sm:$0xff]  ;;  %v102_v2 = vld [vmem:[#allocation3 + $0x28] sm:$0xff] }
  0x39   :  { %67 = vst.msk [vmem:[#allocation2 + $0x10] sm:$0xff] %vm64_vm0, %v1670_v0  ;;  %65 = vst.msk [vmem:[#allocation2] sm:$0xff] %vm64_vm0, %v1670_v0  ;;  %v97_v3 = vld [vmem:[#allocation3] sm:$0xff]  ;;  %v199_v4 = vadd.f32 %v102_v2, %v101_v1  ;;  %v358_v5 = vtrunc.f32 %v101_v1  ;;  %v359_v6 = vtrunc.f32 %v102_v2  ;;  %v98_v7 = vld [vmem:[#allocation3 + $0x8] sm:$0xff]  ;;  %s1672_s24 = smov [#allocation10]  }
  0x3a   :  { %66 = vst.msk [vmem:[#allocation2 + $0x8] sm:$0xff] %vm64_vm0, %v1670_v0  ;;  %68 = vst.msk [vmem:[#allocation2 + $0x18] sm:$0xff] %vm64_vm0, %v1670_v0  ;;  %v354_v8 = vtrunc.f32 %v97_v3  ;;  %v103_v9 = vld [vmem:[#allocation3 + $0x30] sm:$0xff]  ;;  %v104_v10 = vld [vmem:[#allocation3 + $0x38] sm:$0xff]  ;;  %v193_v11 = vadd.f32 %v98_v7, %v97_v3  ;;  %v355_v12 = vtrunc.f32 %v98_v7  ;;  %s1273_s25 = sshll.u32 %s1672_s24, 4  ;;  %s1274_s25 = int_to_ptr.vmem [resolvable:$true] %s1273_s25 }
  0x3b   :  { %69 = vst.msk [vmem:[#allocation2 + $0x20] sm:$0xff] %vm64_vm0, %v1670_v0  ;;  %70 = vst.msk [vmem:[#allocation2 + $0x28] sm:$0xff] %vm64_vm0, %v1670_v0  ;;  %v360_v13 = vtrunc.f32 %v103_v9  ;;  %v99_v14 = vld [vmem:[#allocation3 + $0x10] sm:$0xff]  ;;  %v100_v15 = vld [vmem:[#allocation3 + $0x18] sm:$0xff]  ;;  %200 = vadd.xlane.f32.xlu1 %v199_v4  ;;  %v202_v16 = vadd.f32 %v104_v10, %v103_v9  ;;  %v361_v17 = vtrunc.f32 %v104_v10  ;;  %s1611_s26 = scalar_lea.vmem %s1274_s25, 2048  ;;  %p1616_p11 = scmp.lt.s32.totalorder %s1274_s25, %s1274_s25 }
  0x3c   :  { %71 = vst.msk [vmem:[#allocation2 + $0x30] sm:$0xff] %vm64_vm0, %v1670_v0  ;;  %72 = vst.msk [vmem:[#allocation2 + $0x38] sm:$0xff] %vm64_vm0, %v1670_v0  ;;  %v356_v18 = vtrunc.f32 %v99_v14  ;;  %v357_v19 = vtrunc.f32 %v100_v15  ;;  %v107_v20 = vld [vmem:[#allocation3 + $0x50] sm:$0xff]  ;;  %v108_v21 = vld [vmem:[#allocation3 + $0x58] sm:$0xff]  ;;  %194 = vadd.xlane.f32.xlu0 %v193_v11  ;;  %v196_v23 = vadd.f32 %v100_v15, %v99_v14  ;;  %p1612_p10 = scmp.ne.s32.totalorder %s1274_s25, %s1611_s26  ;;  %p1617_p12 = scmp.lt.s32.totalorder %s1611_s26, %s1611_s26 }
  0x3d   :  { %73 = vst.msk [vmem:[#allocation2 + $0x40] sm:$0xff] %vm64_vm0, %v1670_v0  ;;  %74 = vst.msk [vmem:[#allocation2 + $0x48] sm:$0xff] %vm64_vm0, %v1670_v0  ;;  %v422_v22 = vpack.c.f32.eXmY %v358_v5, %v360_v13, 312  ;;  %v364_v24 = vtrunc.f32 %v107_v20  ;;  %v365_v25 = vtrunc.f32 %v108_v21  ;;  %v105_v26 = vld [vmem:[#allocation3 + $0x40] sm:$0xff]  ;;  %v106_v27 = vld [vmem:[#allocation3 + $0x48] sm:$0xff]  ;;  %v432_v28 = vpack.c.f32.eXmY %v359_v6, %v361_v17, 312 }
  0x3e   :  { %75 = vst.msk [vmem:[#allocation2 + $0x50] sm:$0xff] %vm64_vm0, %v1670_v0  ;;  %76 = vst.msk [vmem:[#allocation2 + $0x58] sm:$0xff] %vm64_vm0, %v1670_v0  ;;  %v418_v29 = vpack.c.f32.eXmY %v354_v8, %v356_v18, 312  ;;  %v362_v30 = vtrunc.f32 %v105_v26  ;;  %v111_v31 = vld [vmem:[#allocation3 + $0x70] sm:$0xff]  ;;  %v428_v32 = vpack.c.f32.eXmY %v355_v12, %v357_v19, 312  ;;  %v208_v33 = vadd.f32 %v108_v21, %v107_v20  ;;  %v112_v35 = vld [vmem:[#allocation3 + $0x78] sm:$0xff]  ;;  %p1618_p13 = por %p1617_p12, %p1616_p11 }
  0x3f   :  { %77 = vst.msk [vmem:[#allocation2 + $0x60] sm:$0xff] %vm64_vm0, %v1670_v0  ;;  %78 = vst.msk [vmem:[#allocation2 + $0x68] sm:$0xff] %vm64_vm0, %v1670_v0  ;;  %v363_v34 = vtrunc.f32 %v106_v27  ;;  %v368_v36 = vtrunc.f32 %v111_v31  ;;  %203 = vadd.xlane.f32.xlu1 %v202_v16  ;;  %v205_v38 = vadd.f32 %v106_v27, %v105_v26  ;;  %v369_v40 = vtrunc.f32 %v112_v35  ;;  %v109_v41 = vld [vmem:[#allocation3 + $0x60] sm:$0xff]  ;;  %v110_v42 = vld [vmem:[#allocation3 + $0x68] sm:$0xff] }
  0x40   :  { %79 = vst.msk [vmem:[#allocation2 + $0x70] sm:$0xff] %vm64_vm0, %v1670_v0  ;;  %80 = vst.msk [vmem:[#allocation2 + $0x78] sm:$0xff] %vm64_vm0, %v1670_v0  ;;  %v426_v37 = vpack.c.b8 %v422_v22, %v418_v29  ;;  %v438_v39 = vpack.c.f32.eXmY %v362_v30, %v364_v24, 312  ;;  %v436_v43 = vpack.c.b8 %v432_v28, %v428_v32  ;;  %197 = vadd.xlane.f32.xlu0 %v196_v23  ;;  %v115_v47 = vld [vmem:[#allocation3 + $0x90] sm:$0xff]  ;;  %v116_v48 = vld [vmem:[#allocation3 + $0x98] sm:$0xff]  ;;  %p1619_p0 = pnand %p1618_p13, %p1612_p10 }
  0x41   :  { %81 = vst.msk [vmem:[#allocation2 + $0x80] sm:$0xff] %vm64_vm0, %v1670_v0  ;;  %82 = vst.msk [vmem:[#allocation2 + $0x88] sm:$0xff] %vm64_vm0, %v1670_v0  ;;  %v448_v44 = vpack.c.f32.eXmY %v363_v34, %v365_v25, 312  ;;  %v366_v45 = vtrunc.f32 %v109_v41  ;;  %v367_v46 = vtrunc.f32 %v110_v42  ;;  %v372_v49 = vtrunc.f32 %v115_v47  ;;  %v119_v53 = vld [vmem:[#allocation3 + $0xb0] sm:$0xff]  ;;  %v113_v54 = vld [vmem:[#allocation3 + $0x80] sm:$0xff] }
  0x42   :  { %83 = vst.msk [vmem:[#allocation2 + $0x90] sm:$0xff] %vm64_vm0, %v1670_v0  ;;  %84 = vst.msk [vmem:[#allocation2 + $0x98] sm:$0xff] %vm64_vm0, %v1670_v0  ;;  %v373_v52 = vtrunc.f32 %v116_v48  ;;  %v114_v55 = vld [vmem:[#allocation3 + $0x88] sm:$0xff]  ;;  %v214_v56 = vadd.f32 %v112_v35, %v111_v31  ;;  %v120_v57 = vld [vmem:[#allocation3 + $0xb8] sm:$0xff]  ;;  %v376_v58 = vtrunc.f32 %v119_v53  ;;  %v370_v59 = vtrunc.f32 %v113_v54 }
  0x43   :  { %85 = vst.msk [vmem:[#allocation2 + $0xa0] sm:$0xff] %vm64_vm0, %v1670_v0  ;;  %86 = vst.msk [vmem:[#allocation2 + $0xa8] sm:$0xff] %vm64_vm0, %v1670_v0  ;;  %v442_v50 = vpack.c.f32.eXmY %v366_v45, %v368_v36, 312  ;;  %v452_v51 = vpack.c.f32.eXmY %v367_v46, %v369_v40, 312  ;;  %209 = vadd.xlane.f32.xlu1 %v208_v33  ;;  %v371_v60 = vtrunc.f32 %v114_v55  ;;  %v1781_v1 = vld [vmem:[#allocation3 + $0xd0] sm:$0xff]  ;;  %v117_v2 = vld [vmem:[#allocation3 + $0xa0] sm:$0xff] }
  0x44   :  { %87 = vst.msk [vmem:[#allocation2 + $0xb0] sm:$0xff] %vm64_vm0, %v1670_v0  ;;  %88 = vst.msk [vmem:[#allocation2 + $0xb8] sm:$0xff] %vm64_vm0, %v1670_v0  ;;  %206 = vadd.xlane.f32.xlu0 %v205_v38  ;;  %v211_v61 = vadd.f32 %v110_v42, %v109_v41  ;;  %v458_v3 = vpack.c.f32.eXmY %v370_v59, %v372_v49, 312  ;;  %v1783_v4 = vld [vmem:[#allocation3 + $0xd8] sm:$0xff]  ;;  %v380_v5 = vtrunc.f32 %v1781_v1  ;;  %v118_v6 = vld [vmem:[#allocation3 + $0xa8] sm:$0xff]  ;;  %v374_v7 = vtrunc.f32 %v117_v2 }
  0x45   :  { %89 = vst.msk [vmem:[#allocation2 + $0xc0] sm:$0xff] %vm64_vm0, %v1670_v0  ;;  %90 = vst.msk [vmem:[#allocation2 + $0xc8] sm:$0xff] %vm64_vm0, %v1670_v0  ;;  %v446_v62 = vpack.c.b8 %v442_v50, %v438_v39  ;;  %v456_v63 = vpack.c.b8 %v452_v51, %v448_v44  ;;  %v468_v8 = vpack.c.f32.eXmY %v371_v60, %v373_v52, 312  ;;  %v381_v9 = vtrunc.f32 %v1783_v4  ;;  %v121_v11 = vld [vmem:[#allocation3 + $0xc0] sm:$0xff]  ;;  %v122_v12 = vld [vmem:[#allocation3 + $0xc8] sm:$0xff] }
  0x46   :  { %91 = vst.msk [vmem:[#allocation2 + $0xd0] sm:$0xff] %vm64_vm0, %v1670_v0  ;;  %92 = vst.msk [vmem:[#allocation2 + $0xd8] sm:$0xff] %vm64_vm0, %v1670_v0  ;;  %v375_v10 = vtrunc.f32 %v118_v6  ;;  %v220_v13 = vadd.f32 %v116_v48, %v115_v47  ;;  %v462_v14 = vpack.c.f32.eXmY %v374_v7, %v376_v58, 312  ;;  %v1787_v15 = vld [vmem:[#allocation3 + $0xf0] sm:$0xff]  ;;  %v1789_v16 = vld [vmem:[#allocation3 + $0xf8] sm:$0xff]  ;;  %v378_v17 = vtrunc.f32 %v121_v11 }
  0x47   :  { %93 = vst.msk [vmem:[#allocation2 + $0xe0] sm:$0xff] %vm64_vm0, %v1670_v0  ;;  %94 = vst.msk [vmem:[#allocation2 + $0xe8] sm:$0xff] %vm64_vm0, %v1670_v0  ;;  %215 = vadd.xlane.f32.xlu1 %v214_v56  ;;  %v379_v18 = vtrunc.f32 %v122_v12  ;;  %v217_v19 = vadd.f32 %v114_v55, %v113_v54  ;;  %v384_v21 = vtrunc.f32 %v1787_v15  ;;  %v385_v22 = vtrunc.f32 %v1789_v16  ;;  %v1793_v23 = vld [vmem:[#allocation3 + $0x110] sm:$0xff]  ;;  %v1796_v27 = vld [vmem:[#allocation3 + $0xe0] sm:$0xff] }
  0x48   :  { %95 = vst.msk [vmem:[#allocation2 + $0xf0] sm:$0xff] %vm64_vm0, %v1670_v0  ;;  %96 = vst.msk [vmem:[#allocation2 + $0xf8] sm:$0xff] %vm64_vm0, %v1670_v0  ;;  %v377_v0 = vtrunc.f32 %v120_v57  ;;  %212 = vadd.xlane.f32.xlu0 %v211_v61  ;;  %v466_v24 = vpack.c.b8 %v462_v14, %v458_v3  ;;  %v478_v25 = vpack.c.f32.eXmY %v378_v17, %v380_v5, 312  ;;  %v388_v26 = vtrunc.f32 %v1793_v23  ;;  %v1798_v28 = vld [vmem:[#allocation3 + $0xe8] sm:$0xff]  ;;  %v1800_v31 = vld [vmem:[#allocation3 + $0x118] sm:$0xff] }
  0x49   :  { %578 = vst [vmem:[#allocation10] sm:$0xff] %v426_v37  ;;  %579 = vst [vmem:[#allocation10 + $0x8] sm:$0xff] %v436_v43  ;;  %v488_v30 = vpack.c.f32.eXmY %v379_v18, %v381_v9, 312  ;;  %v382_v32 = vtrunc.f32 %v1796_v27  ;;  %v383_v33 = vtrunc.f32 %v1798_v28  ;;  %v1804_v34 = vld [vmem:[#allocation3 + $0x100] sm:$0xff]  ;;  %v226_v35 = vadd.f32 %v120_v57, %v119_v53  ;;  %v1807_v38 = vld [vmem:[#allocation3 + $0x130] sm:$0xff] }
  0x4a   :  { %580 = vst [vmem:[#allocation10 + $0x10] sm:$0xff] %v446_v62  ;;  %581 = vst [vmem:[#allocation10 + $0x18] sm:$0xff] %v456_v63  ;;  %v472_v20 = vpack.c.f32.eXmY %v375_v10, %v377_v0, 312  ;;  %v223_v36 = vadd.f32 %v118_v6, %v117_v2  ;;  %v389_v37 = vtrunc.f32 %v1800_v31  ;;  %v1809_v39 = vld [vmem:[#allocation3 + $0x108] sm:$0xff]  ;;  %v386_v40 = vtrunc.f32 %v1804_v34  ;;  %v1812_v43 = vld [vmem:[#allocation3 + $0x138] sm:$0xff] }
  0x4b   :  { %221 = vadd.xlane.f32.xlu1 %v220_v13  ;;  %582 = vst [vmem:[#allocation10 + $0x20] sm:$0xff] %v466_v24  ;;  %v482_v41 = vpack.c.f32.eXmY %v382_v32, %v384_v21, 312  ;;  %v492_v42 = vpack.c.f32.eXmY %v383_v33, %v385_v22, 312  ;;  %v392_v44 = vtrunc.f32 %v1807_v38  ;;  %v387_v45 = vtrunc.f32 %v1809_v39  ;;  %v1817_v48 = vld [vmem:[#allocation3 + $0x150] sm:$0xff]  ;;  %v1819_v49 = vld [vmem:[#allocation3 + $0x158] sm:$0xff]  ;;  %v1821_v50 = vld [vmem:[#allocation3 + $0x120] sm:$0xff] }
  0x4c   :  { %v476_v29 = vpack.c.b8 %v472_v20, %v468_v8  ;;  %218 = vadd.xlane.f32.xlu0 %v217_v19  ;;  %v393_v46 = vtrunc.f32 %v1812_v43  ;;  %v498_v47 = vpack.c.f32.eXmY %v386_v40, %v388_v26, 312  ;;  %v396_v53 = vtrunc.f32 %v1817_v48  ;;  %v1824_v54 = vld [vmem:[#allocation3 + $0x128] sm:$0xff]  ;;  %v789_v56 = vld [vmem:[#allocation8] sm:$0xff]  ;;  %v1835_v3 = vld [vmem:[#allocation3 + $0x170] sm:$0xff] }
  0x4d   :  { %v486_v51 = vpack.c.b8 %v482_v41, %v478_v25  ;;  %v496_v52 = vpack.c.b8 %v492_v42, %v488_v30  ;;  %v390_v55 = vtrunc.f32 %v1821_v50  ;;  %v790_v57 = vld [vmem:[#allocation8 + $0x8] sm:$0xff]  ;;  %v232_v58 = vadd.f32 %v1783_v4, %v1781_v1  ;;  %v1831_v62 = vld [vmem:[#allocation3 + $0x140] sm:$0xff]  ;;  %v1837_v5 = vld [vmem:[#allocation3 + $0x178] sm:$0xff] }
  0x4e   :  { %583 = vst [vmem:[#allocation10 + $0x28] sm:$0xff] %v476_v29  ;;  %v508_v59 = vpack.c.f32.eXmY %v387_v45, %v389_v37, 312  ;;  %v397_v60 = vtrunc.f32 %v1819_v49  ;;  %v391_v61 = vtrunc.f32 %v1824_v54  ;;  %v1833_v63 = vld [vmem:[#allocation3 + $0x148] sm:$0xff]  ;;  %v229_v0 = vadd.f32 %v122_v12, %v121_v11  ;;  %v1843_v10 = vld [vmem:[#allocation3 + $0x190] sm:$0xff]  ;;  %v792_v12 = vld [vmem:[#allocation8 + $0x18] sm:$0xff] }
  0x4f   :  { %227 = vadd.xlane.f32.xlu1 %v226_v35  ;;  %584 = vst [vmem:[#allocation10 + $0x30] sm:$0xff] %v486_v51  ;;  %585 = vst [vmem:[#allocation10 + $0x38] sm:$0xff] %v496_v52  ;;  %v502_v2 = vpack.c.f32.eXmY %v390_v55, %v392_v44, 312  ;;  %v394_v1 = vtrunc.f32 %v1831_v62  ;;  %v395_v4 = vtrunc.f32 %v1833_v63  ;;  %v400_v7 = vtrunc.f32 %v1835_v3  ;;  %v791_v11 = vld [vmem:[#allocation8 + $0x10] sm:$0xff]  ;;  %v1847_v18 = vld [vmem:[#allocation3 + $0x160] sm:$0xff] }
  0x50   :  { %224 = vadd.xlane.f32.xlu0 %v223_v36  ;;  %v512_v6 = vpack.c.f32.eXmY %v391_v61, %v393_v46, 312  ;;  %v401_v8 = vtrunc.f32 %v1837_v5  ;;  %v1420_v9 = vpack.c.bf16 %v790_v57, %v789_v56  ;;  %v238_v13 = vadd.f32 %v1789_v16, %v1787_v15  ;;  %v1849_v19 = vld [vmem:[#allocation3 + $0x168] sm:$0xff]  ;;  %v757_v20 = vld [vmem:[#allocation6] sm:$0xff]  ;;  %v1851_v24 = vld [vmem:[#allocation3 + $0x198] sm:$0xff] }
  0x51   :  { %v506_v14 = vpack.c.b8 %v502_v2, %v498_v47  ;;  %v518_v17 = vpack.c.f32.eXmY %v394_v1, %v396_v53, 312  ;;  %v528_v22 = vpack.c.f32.eXmY %v395_v4, %v397_v60, 312  ;;  %v398_v25 = vtrunc.f32 %v1847_v18  ;;  %v793_v29 = vld [vmem:[#allocation8 + $0x20] sm:$0xff]  ;;  %v794_v30 = vld [vmem:[#allocation8 + $0x28] sm:$0xff]  ;;  %v1863_v41 = vld [vmem:[#allocation3 + $0x1b0] sm:$0xff]  ;;  %1372 = vmatprep.mubr.f32.mxu0 %v757_v20 }
  0x52   :  { %v516_v21 = vpack.c.b8 %v512_v6, %v508_v59  ;;  %1421 = vmatprep.subr.bf16.mxu0 %v1420_v9  ;;  %v399_v26 = vtrunc.f32 %v1849_v19  ;;  %v235_v15 = vadd.f32 %v1798_v28, %v1796_v27  ;;  %v404_v16 = vtrunc.f32 %v1843_v10  ;;  %v1859_v35 = vld [vmem:[#allocation3 + $0x180] sm:$0xff]  ;;  %v1865_v42 = vld [vmem:[#allocation3 + $0x1b8] sm:$0xff]  ;;  %v1867_v27 = vld [vmem:[#allocation3 + $0x188] sm:$0xff]  ;;  %1452 = vmatprep.subr.bf16.mxu1 %v1420_v9 }
  0x53   :  { %233 = vadd.xlane.f32.xlu1 %v232_v58  ;;  %586 = vst [vmem:[#allocation10 + $0x40] sm:$0xff] %v506_v14  ;;  %1423 = vmatpush3.bf16.msra.mxu0 %v1420_v9  ;;  %v405_v32 = vtrunc.f32 %v1851_v24  ;;  %v1424_v33 = vpack.c.bf16 %v792_v12, %v791_v11  ;;  %v244_v36 = vadd.f32 %v1800_v31, %v1793_v23  ;;  %v402_v28 = vtrunc.f32 %v1859_v35  ;;  %v1873_v46 = vld [vmem:[#allocation3 + $0x1d0] sm:$0xff]  ;;  %v796_v51 = vld [vmem:[#allocation8 + $0x38] sm:$0xff]  ;;  %v1878_v57 = vld [vmem:[#allocation3 + $0x1a0] sm:$0xff] }
  0x54   :  { %230 = vadd.xlane.f32.xlu0 %v229_v0  ;;  %587 = vst [vmem:[#allocation10 + $0x48] sm:$0xff] %v516_v21  ;;  %v522_v37 = vpack.c.f32.eXmY %v398_v25, %v400_v7, 312  ;;  %v532_v40 = vpack.c.f32.eXmY %v399_v26, %v401_v8, 312  ;;  %v408_v44 = vtrunc.f32 %v1863_v41  ;;  %v409_v45 = vtrunc.f32 %v1865_v42  ;;  %v795_v47 = vld [vmem:[#allocation8 + $0x30] sm:$0xff]  ;;  %1460 = vmatpush3.bf16.msra.mxu1 %v1420_v9  ;;  %v1880_v58 = vld [vmem:[#allocation3 + $0x1a8] sm:$0xff]  ;;  %v1882_v61 = vld [vmem:[#allocation3 + $0x1d8] sm:$0xff] }
  0x55   :  { %1425 = vmatprep.subr.bf16.mxu0 %v1424_v33  ;;  %v403_v23 = vtrunc.f32 %v1867_v27  ;;  %v1428_v31 = vpack.c.bf16 %v794_v30, %v793_v29  ;;  %v241_v52 = vadd.f32 %v1809_v39, %v1804_v34  ;;  %v412_v56 = vtrunc.f32 %v1873_v46  ;;  %1453 = vmatprep.subr.bf16.mxu1 %v1424_v33  ;;  %v1886_v34 = vld [vmem:[#allocation3 + $0x1f0] sm:$0xff]  ;;  %v773_v39 = vld [vmem:[#allocation6 + $0x80] sm:$0xff]  ;;  %v1889_v6 = vld [vmem:[#allocation3 + $0x1f8] sm:$0xff] }
  0x56   :  { %v526_v53 = vpack.c.b8 %v522_v37, %v518_v17  ;;  %v536_v55 = vpack.c.b8 %v532_v40, %v528_v22  ;;  %v538_v59 = vpack.c.f32.eXmY %v402_v28, %v404_v16, 312  ;;  %v406_v0 = vtrunc.f32 %v1878_v57  ;;  %v1892_v8 = vld [vmem:[#allocation3 + $0x1c0] sm:$0xff]  ;;  %v1894_v9 = vld [vmem:[#allocation3 + $0x1c8] sm:$0xff]  ;;  %1396 = vmatprep.mubr.f32.mxu1 %v773_v39  ;;  %v800_v37 = vld [vmem:[#allocation8 + $0x58] sm:$0xff] }
  0x57   :  { %239 = vadd.xlane.f32.xlu1 %v238_v13  ;;  %1427 = vmatpush3.bf16.msra.mxu0 %v1424_v33  ;;  %v548_v60 = vpack.c.f32.eXmY %v403_v23, %v405_v32, 312  ;;  %v407_v2 = vtrunc.f32 %v1880_v58  ;;  %v413_v1 = vtrunc.f32 %v1882_v61  ;;  %v1432_v4 = vpack.c.bf16 %v796_v51, %v795_v47  ;;  %v797_v17 = vld [vmem:[#allocation8 + $0x40] sm:$0xff]  ;;  %v798_v20 = vld [vmem:[#allocation8 + $0x48] sm:$0xff] }
  0x58   :  { %236 = vadd.xlane.f32.xlu0 %v235_v15  ;;  %588 = vst [vmem:[#allocation10 + $0x50] sm:$0xff] %v526_v53  ;;  %589 = vst [vmem:[#allocation10 + $0x58] sm:$0xff] %v536_v55  ;;  %1429 = vmatprep.subr.bf16.mxu0 %v1428_v31  ;;  %v416_v7 = vtrunc.f32 %v1886_v34  ;;  %v542_v11 = vpack.c.f32.eXmY %v406_v0, %v408_v44, 312  ;;  %v417_v13 = vtrunc.f32 %v1889_v6  ;;  %v410_v14 = vtrunc.f32 %v1892_v8  ;;  %v1898_v21 = vld [vmem:[#allocation3 + $0x1e0] sm:$0xff]  ;;  %v1905_v29 = vld [vmem:[#allocation3 + $0x1e8] sm:$0xff] }
  0x59   :  { %v552_v12 = vpack.c.f32.eXmY %v407_v2, %v409_v45, 312  ;;  %1461 = vmatpush3.bf16.msra.mxu1 %v1424_v33  ;;  %v250_v22 = vadd.f32 %v1812_v43, %v1807_v38  ;;  %v247_v25 = vadd.f32 %v1824_v54, %v1821_v50  ;;  %v411_v26 = vtrunc.f32 %v1894_v9  ;;  %v799_v54 = vld [vmem:[#allocation8 + $0x50] sm:$0xff]  ;;  %v801_v51 = vld [vmem:[#allocation8 + $0x60] sm:$0xff]  ;;  %v778_v0 = vld [vmem:[#allocation6 + $0xa8] sm:$0xff] }
  0x5a   :  { %v414_v30 = vtrunc.f32 %v1898_v21  ;;  %1454 = vmatprep.subr.bf16.mxu1 %v1428_v31  ;;  %v546_v15 = vpack.c.b8 %v542_v11, %v538_v59  ;;  %v558_v32 = vpack.c.f32.eXmY %v410_v14, %v412_v56, 312  ;;  %v415_v33 = vtrunc.f32 %v1905_v29  ;;  %v775_v55 = vld [vmem:[#allocation6 + $0x90] sm:$0xff]  ;;  %v760_v56 = vld [vmem:[#allocation6 + $0x18] sm:$0xff]  ;;  %v777_v59 = vld [vmem:[#allocation6 + $0xa0] sm:$0xff] }
  0x5b   :  { %245 = vadd.xlane.f32.xlu1 %v244_v36  ;;  %1431 = vmatpush3.bf16.msra.mxu0 %v1428_v31  ;;  %v556_v16 = vpack.c.b8 %v552_v12, %v548_v60  ;;  %v568_v36 = vpack.c.f32.eXmY %v411_v26, %v413_v1, 312  ;;  %v1436_v38 = vpack.c.bf16 %v798_v20, %v797_v17  ;;  %v1671_v47 = vmov 0   ;;  %v762_v60 = vld [vmem:[#allocation6 + $0x28] sm:$0xff]  ;;  %v779_v2 = vld [vmem:[#allocation6 + $0xb0] sm:$0xff]  ;;  %v765_v39 = vld [vmem:[#allocation6 + $0x40] sm:$0xff] }
  0x5c   :  { %242 = vadd.xlane.f32.xlu0 %v241_v52  ;;  %1433 = vmatprep.subr.bf16.mxu0 %v1432_v4  ;;  %v562_v43 = vpack.c.f32.eXmY %v414_v30, %v416_v7, 312  ;;  %590 = vst [vmem:[#allocation10 + $0x60] sm:$0xff] %v546_v15  ;;  %v572_v50 = vpack.c.f32.eXmY %v415_v33, %v417_v13, 312  ;;  %v256_v40 = vadd.f32 %v1819_v49, %v1817_v48  ;;  %v804_v52 = vld [vmem:[#allocation8 + $0x78] sm:$0xff]  ;;  %v767_v7 = vld [vmem:[#allocation6 + $0x50] sm:$0xff]  ;;  %v769_v12 = vld [vmem:[#allocation6 + $0x60] sm:$0xff] }
  0x5d   :  { %591 = vst [vmem:[#allocation10 + $0x68] sm:$0xff] %v556_v16  ;;  %1462 = vmatpush3.bf16.msra.mxu1 %v1428_v31  ;;  %v253_v44 = vadd.f32 %v1833_v63, %v1831_v62  ;;  %v1440_v23 = vpack.c.bf16 %v800_v37, %v799_v54  ;;  %1479 = vset.pattern.permute.xlu0 %v1671_v47  ;;  %v802_v31 = vld [vmem:[#allocation8 + $0x68] sm:$0xff]  ;;  %v803_v63 = vld [vmem:[#allocation8 + $0x70] sm:$0xff]  ;;  %v780_v1 = vld [vmem:[#allocation6 + $0xb8] sm:$0xff] }
  0x5e   :  { %v566_v28 = vpack.c.b8 %v562_v43, %v558_v32  ;;  %1455 = vmatprep.subr.bf16.mxu1 %v1432_v4  ;;  %v576_v45 = vpack.c.b8 %v572_v50, %v568_v36  ;;  %1480 = vset.pattern.permute.xlu1 %v1671_v47  ;;  %v262_v48 = vadd.f32 %v1837_v5, %v1835_v3  ;;  %v768_v11 = vld [vmem:[#allocation6 + $0x58] sm:$0xff]  ;;  %v785_v14 = vld [vmem:[#allocation6 + $0xe0] sm:$0xff]  ;;  %v770_v17 = vld [vmem:[#allocation6 + $0x68] sm:$0xff] }
  0x5f   :  { %251 = vadd.xlane.f32.xlu1 %v250_v22  ;;  %1435 = vmatpush3.bf16.msra.mxu0 %v1432_v4  ;;  %v259_v49 = vadd.f32 %v1849_v19, %v1847_v18  ;;  %v1444_v62 = vpack.c.bf16 %v802_v31, %v801_v51  ;;  %v268_v53 = vadd.f32 %v1851_v24, %v1843_v10  ;;  %v784_v13 = vld [vmem:[#allocation6 + $0xd8] sm:$0xff]  ;;  %v771_v20 = vld [vmem:[#allocation6 + $0x70] sm:$0xff]  ;;  %v161_v30 = vld [vmem:[#allocation2] sm:$0xff] }
  0x60   :  { %248 = vadd.xlane.f32.xlu0 %v247_v25  ;;  %1437 = vmatprep.subr.bf16.mxu0 %v1436_v38  ;;  %592 = vst [vmem:[#allocation10 + $0x70] sm:$0xff] %v566_v28  ;;  %593 = vst [vmem:[#allocation10 + $0x78] sm:$0xff] %v576_v45  ;;  %v265_v3 = vadd.f32 %v1867_v27, %v1859_v35  ;;  %v1448_v5 = vpack.c.bf16 %v804_v52, %v803_v63  ;;  %v758_v35 = vld [vmem:[#allocation6 + $0x8] sm:$0xff]  ;;  %v787_v22 = vld [vmem:[#allocation6 + $0xf0] sm:$0xff] }
  0x61   :  { %1463 = vmatpush3.bf16.msra.mxu1 %v1432_v4  ;;  %v274_v18 = vadd.f32 %v1865_v42, %v1863_v41  ;;  %v271_v19 = vadd.f32 %v1880_v58, %v1878_v57  ;;  %v280_v10 = vadd.f32 %v1882_v61, %v1873_v46  ;;  %v277_v24 = vadd.f32 %v1894_v9, %v1892_v8  ;;  %v759_v41 = vld [vmem:[#allocation6 + $0x10] sm:$0xff]  ;;  %v774_v42 = vld [vmem:[#allocation6 + $0x88] sm:$0xff]  ;;  %v761_v57 = vld [vmem:[#allocation6 + $0x20] sm:$0xff] }
  0x62   :  { %1456 = vmatprep.subr.bf16.mxu1 %v1436_v38  ;;  %v286_v27 = vadd.f32 %v1889_v6, %v1886_v34  ;;  %v283_v46 = vadd.f32 %v1905_v29, %v1898_v21  ;;  %v776_v58 = vld [vmem:[#allocation6 + $0x98] sm:$0xff]  ;;  %v763_v61 = vld [vmem:[#allocation6 + $0x30] sm:$0xff]  ;;  %v781_v4 = vld [vmem:[#allocation6 + $0xc0] sm:$0xff] }
  0x63   :  { %257 = vadd.xlane.f32.xlu1 %v256_v40  ;;  %1439 = vmatpush3.bf16.msra.mxu0 %v1436_v38  ;;  %v764_v34 = vld [vmem:[#allocation6 + $0x38] sm:$0xff]  ;;  %v766_v6 = vld [vmem:[#allocation6 + $0x48] sm:$0xff]  ;;  %v783_v9 = vld [vmem:[#allocation6 + $0xd0] sm:$0xff] }
  0x64   :  { %254 = vadd.xlane.f32.xlu0 %v253_v44  ;;  %1441 = vmatprep.subr.bf16.mxu0 %v1440_v23  ;;  %v782_v8 = vld [vmem:[#allocation6 + $0xc8] sm:$0xff]  ;;  %v772_v25 = vld [vmem:[#allocation6 + $0x78] sm:$0xff]  ;;  %v163_v29 = vld [vmem:[#allocation2 + $0x10] sm:$0xff] }
  0x65   :  { %1464 = vmatpush3.bf16.msra.mxu1 %v1436_v38  ;;  %v786_v21 = vld [vmem:[#allocation6 + $0xe8] sm:$0xff]  ;;  %v788_v26 = vld [vmem:[#allocation6 + $0xf8] sm:$0xff]  ;;  %v165_v28 = vld [vmem:[#allocation2 + $0x20] sm:$0xff] }
  0x66   :  { %1457 = vmatprep.subr.bf16.mxu1 %v1440_v23  ;;  %v164_v36 = vld [vmem:[#allocation2 + $0x18] sm:$0xff]  ;;  %v162_v38 = vld [vmem:[#allocation2 + $0x8] sm:$0xff] }
  0x67   :  { %263 = vadd.xlane.f32.xlu1 %v262_v48  ;;  %1443 = vmatpush3.bf16.msra.mxu0 %v1440_v23  ;;  %v166_v40 = vld [vmem:[#allocation2 + $0x28] sm:$0xff]  ;;  %v168_v51 = vld [vmem:[#allocation2 + $0x38] sm:$0xff]  ;;  %v167_v48 = vld [vmem:[#allocation2 + $0x30] sm:$0xff] }
  0x68   :  { %260 = vadd.xlane.f32.xlu0 %v259_v49  ;;  %1445 = vmatprep.subr.bf16.mxu0 %v1444_v62 }
  0x69   :  { %1465 = vmatpush3.bf16.msra.mxu1 %v1440_v23 }
  0x6a   :  { %1458 = vmatprep.subr.bf16.mxu1 %v1444_v62 }
  0x6b   :  { %269 = vadd.xlane.f32.xlu1 %v268_v53  ;;  %1447 = vmatpush3.bf16.msra.mxu0 %v1444_v62 }
  0x6c   :  { %266 = vadd.xlane.f32.xlu0 %v265_v3  ;;  %1449 = vmatprep.subr.bf16.mxu0 %v1448_v5  ;;  %v170_v3 = vld [vmem:[#allocation2 + $0x48] sm:$0xff] }
  0x6d   :  { %1466 = vmatpush3.bf16.msra.mxu1 %v1444_v62 }
  0x6e   :  { %1459 = vmatprep.subr.bf16.mxu1 %v1448_v5 }
  0x6f   :  { %275 = vadd.xlane.f32.xlu1 %v274_v18  ;;  %1451 = vmatpush3.bf16.msra.mxu0 %v1448_v5  ;;  %v169_v18 = vld [vmem:[#allocation2 + $0x40] sm:$0xff] }
  0x70   :  { %272 = vadd.xlane.f32.xlu0 %v271_v19 }
  0x71   :  { %1467 = vmatpush3.bf16.msra.mxu1 %v1448_v5 }
  0x72   :  { %1373 = vmatmul.mubr.f32.vlgmr.msra.gmra.mrb[0].mxu0 %v758_v35 }
  0x73   :  { %281 = vadd.xlane.f32.xlu1 %v280_v10  ;;  %1375 = vmatprep.mubr.f32.mxu0 %v759_v41  ;;  %v172_v41 = vld [vmem:[#allocation2 + $0x58] sm:$0xff] }
  0x74   :  { %278 = vadd.xlane.f32.xlu0 %v277_v24  ;;  %1397 = vmatmul.mubr.f32.vlgmr.msra.gmra.mrb[0].mxu1 %v774_v42 }
  0x75   :  { %1399 = vmatprep.mubr.f32.mxu1 %v775_v55  ;;  %v171_v55 = vld [vmem:[#allocation2 + $0x50] sm:$0xff] }
  0x76   :  { %1376 = vmatmul.mubr.f32.gmra.mrb[2].mxu0 %v760_v56 }
  0x77   :  { %287 = vadd.xlane.f32.xlu1 %v286_v27  ;;  %1378 = vmatprep.mubr.f32.mxu0 %v761_v57 }
  0x78   :  { %284 = vadd.xlane.f32.xlu0 %v283_v46  ;;  %1400 = vmatmul.mubr.f32.gmra.mrb[2].mxu1 %v776_v58 }
  0x79   :  { %1402 = vmatprep.mubr.f32.mxu1 %v777_v59 }
  0x7a   :  { %1379 = vmatmul.mubr.f32.gmra.mrb[4].mxu0 %v762_v60 }
  0x7b   :  { %1381 = vmatprep.mubr.f32.mxu0 %v763_v61  ;;  %v174_v61 = vld [vmem:[#allocation2 + $0x68] sm:$0xff] }
  0x7c   :  { %1403 = vmatmul.mubr.f32.gmra.mrb[4].mxu1 %v778_v0 }
  0x7d   :  { %1405 = vmatprep.mubr.f32.mxu1 %v779_v2 }
  0x7e   :  { %1382 = vmatmul.mubr.f32.gmra.mrb[6].mxu0 %v764_v34 }
  0x7f   :  { %1384 = vmatprep.mubr.f32.mxu0 %v765_v39 }
  0x80   :  { %1406 = vmatmul.mubr.f32.gmra.mrb[6].mxu1 %v780_v1  ;;  %v173_v1 = vld [vmem:[#allocation2 + $0x60] sm:$0xff] }
  0x81   :  { %1408 = vmatprep.mubr.f32.mxu1 %v781_v4 }
  0x82   :  { %1385 = vmatmul.mubr.f32.gmra.mrb[8].mxu0 %v766_v6 }
  0x83   :  { %1387 = vmatprep.mubr.f32.mxu0 %v767_v7 }
  0x84   :  { %1409 = vmatmul.mubr.f32.gmra.mrb[8].mxu1 %v782_v8 }
  0x85   :  { %1411 = vmatprep.mubr.f32.mxu1 %v783_v9 }
  0x86   :  { %1388 = vmatmul.mubr.f32.gmra.mrb[10].mxu0 %v768_v11 }
  0x87   :  { %1390 = vmatprep.mubr.f32.mxu0 %v769_v12  ;;  %v176_v12 = vld [vmem:[#allocation2 + $0x78] sm:$0xff] }
  0x88   :  { %1412 = vmatmul.mubr.f32.gmra.mrb[10].mxu1 %v784_v13 }
  0x89   :  { %1414 = vmatprep.mubr.f32.mxu1 %v785_v14 }
  0x8a   :  { %1391 = vmatmul.mubr.f32.gmra.mrb[12].mxu0 %v770_v17 }
  0x8b   :  { %1393 = vmatprep.mubr.f32.mxu0 %v771_v20 }
  0x8c   :  { %1415 = vmatmul.mubr.f32.gmra.mrb[12].mxu1 %v786_v21  ;;  %v175_v21 = vld [vmem:[#allocation2 + $0x70] sm:$0xff] }
  0x8d   :  { %1417 = vmatprep.mubr.f32.mxu1 %v787_v22 }
  0x8e   :  { %1394 = vmatmul.mubr.f32.gmra.mrb[14].mxu0 %v772_v25 }
  0x90   :  { %1418 = vmatmul.mubr.f32.gmra.mrb[14].mxu1 %v788_v26 }
  0xc8   :  { %v201_v15 = vpop.xlane.xlu1 %200 }
  0xc9   :  { %v291_v16 = vadd.f32 %v201_v15, %v163_v29  ;;  %v195_v32 = vpop.xlane.xlu0 %194 }
  0xca   :  { %v289_v33 = vadd.f32 %v195_v32, %v161_v30 }
  0xcb   :  { %324 = vst.msk [vmem:[#allocation2 + $0x10] sm:$0xff] %vm64_vm0, %v291_v16  ;;  %v178_v16 = vld [vmem:[#allocation2 + $0x88] sm:$0xff] }
  0xcc   :  { %322 = vst.msk [vmem:[#allocation2] sm:$0xff] %vm64_vm0, %v289_v33  ;;  %v204_v43 = vpop.xlane.xlu1 %203 }
  0xcd   :  { %v292_v50 = vadd.f32 %v204_v43, %v164_v36  ;;  %v198_v54 = vpop.xlane.xlu0 %197 }
  0xce   :  { %v290_v37 = vadd.f32 %v198_v54, %v162_v38  ;;  %v177_v38 = vld [vmem:[#allocation2 + $0x80] sm:$0xff] }
  0xcf   :  { %325 = vst.msk [vmem:[#allocation2 + $0x18] sm:$0xff] %vm64_vm0, %v292_v50 }
  0xd0   :  { %323 = vst.msk [vmem:[#allocation2 + $0x8] sm:$0xff] %vm64_vm0, %v290_v37  ;;  %v210_v44 = vpop.xlane.xlu1 %209 }
  0xd1   :  { %v294_v45 = vadd.f32 %v210_v44, %v166_v40  ;;  %v207_v23 = vpop.xlane.xlu0 %206 }
  0xd2   :  { %v293_v47 = vadd.f32 %v207_v23, %v165_v28  ;;  %v599_v31 = vld [vmem:[#allocation2 + $0x10] sm:$0xff] }
  0xd3   :  { %327 = vst.msk [vmem:[#allocation2 + $0x28] sm:$0xff] %vm64_vm0, %v294_v45  ;;  %v597_v49 = vld [vmem:[#allocation2] sm:$0xff]  ;;  %1481 = vrsqrt.f32 %v599_v31  ;;  %vm631_vm1 = vcmp.gt.f32.partialorder %v599_v31, 0.0  ;;  %v180_v45 = vld [vmem:[#allocation2 + $0x98] sm:$0xff]  ;;  %v179_v31 = vld [vmem:[#allocation2 + $0x90] sm:$0xff] }
  0xd4   :  { %326 = vst.msk [vmem:[#allocation2 + $0x20] sm:$0xff] %vm64_vm0, %v293_v47  ;;  %v216_v62 = vpop.xlane.xlu1 %215  ;;  %1483 = vrsqrt.f32 %v597_v49  ;;  %vm629_vm2 = vcmp.gt.f32.partialorder %v597_v49, 0.0 }
  0xd5   :  { %v296_v63 = vadd.f32 %v216_v62, %v168_v51  ;;  %v213_v52 = vpop.xlane.xlu0 %212 }
  0xd6   :  { %v295_v53 = vadd.f32 %v213_v52, %v167_v48  ;;  %v600_v5 = vld [vmem:[#allocation2 + $0x18] sm:$0xff] }
  0xd7   :  { %329 = vst.msk [vmem:[#allocation2 + $0x38] sm:$0xff] %vm64_vm0, %v296_v63  ;;  %v598_v19 = vld [vmem:[#allocation2 + $0x8] sm:$0xff]  ;;  %1485 = vrsqrt.f32 %v600_v5  ;;  %vm632_vm3 = vcmp.gt.f32.partialorder %v600_v5, 0.0 }
  0xd8   :  { %328 = vst.msk [vmem:[#allocation2 + $0x30] sm:$0xff] %vm64_vm0, %v295_v53  ;;  %v222_v10 = vpop.xlane.xlu1 %221  ;;  %1487 = vrsqrt.f32 %v598_v19  ;;  %vm630_vm4 = vcmp.gt.f32.partialorder %v598_v19, 0.0 }
  0xd9   :  { %v298_v24 = vadd.f32 %v222_v10, %v170_v3  ;;  %v219_v35 = vpop.xlane.xlu0 %218 }
  0xda   :  { %v297_v42 = vadd.f32 %v219_v35, %v169_v18  ;;  %v602_v27 = vld [vmem:[#allocation2 + $0x28] sm:$0xff] }
  0xdb   :  { %331 = vst.msk [vmem:[#allocation2 + $0x48] sm:$0xff] %vm64_vm0, %v298_v24  ;;  %v601_v46 = vld [vmem:[#allocation2 + $0x20] sm:$0xff]  ;;  %1489 = vrsqrt.f32 %v602_v27  ;;  %vm634_vm5 = vcmp.gt.f32.partialorder %v602_v27, 0.0  ;;  %v182_v18 = vld [vmem:[#allocation2 + $0xa8] sm:$0xff] }
  0xdc   :  { %v228_v56 = vpop.xlane.xlu1 %227  ;;  %330 = vst.msk [vmem:[#allocation2 + $0x40] sm:$0xff] %vm64_vm0, %v297_v42  ;;  %1491 = vrsqrt.f32 %v601_v46  ;;  %vm633_vm6 = vcmp.gt.f32.partialorder %v601_v46, 0.0  ;;  %v181_v24 = vld [vmem:[#allocation2 + $0xa0] sm:$0xff] }
  0xdd   :  { %v1482_v57 = vpop.eup %1481  ;;  %v300_v58 = vadd.f32 %v228_v56, %v172_v41  ;;  %v225_v59 = vpop.xlane.xlu0 %224 }
  0xde   :  { %v1484_v60 = vpop.eup %1483  ;;  %v299_v0 = vadd.f32 %v225_v59, %v171_v55  ;;  %v695_v2 = vsel %vm631_vm1, %v1482_v57, 0.0  ;;  %v1943_v34 = vld [vmem:[#allocation2 + $0x38] sm:$0xff] }
  0xdf   :  { %333 = vst.msk [vmem:[#allocation2 + $0x58] sm:$0xff] %vm64_vm0, %v300_v58  ;;  %v693_v39 = vsel %vm629_vm2, %v1484_v60, 0.0  ;;  %727 = vst.msk [vmem:[%s2275_s3 + $0x10] sm:$0xff] %vm64_vm0, %v695_v2  ;;  %v1950_v4 = vld [vmem:[#allocation2 + $0x30] sm:$0xff]  ;;  %1493 = vrsqrt.f32 %v1943_v34  ;;  %vm636_vm7 = vcmp.gt.f32.partialorder %v1943_v34, 0.0  ;;  %v184_v58 = vld [vmem:[#allocation2 + $0xb8] sm:$0xff] }
  0xe0   :  { %1032 = vperm.xlu0 %1479, %v693_v39   ;;  %725 = vst.msk [vmem:[%s2275_s3] sm:$0xff] %vm64_vm0, %v693_v39  ;;  %v234_v6 = vpop.xlane.xlu1 %233  ;;  %332 = vst.msk [vmem:[#allocation2 + $0x50] sm:$0xff] %vm64_vm0, %v299_v0  ;;  %1495 = vrsqrt.f32 %v1950_v4  ;;  %vm635_vm8 = vcmp.gt.f32.partialorder %v1950_v4, 0.0 }
  0xe1   :  { %v1486_v7 = vpop.eup %1485  ;;  %v302_v8 = vadd.f32 %v234_v6, %v174_v61  ;;  %v231_v9 = vpop.xlane.xlu0 %230  ;;  %v183_v61 = vld [vmem:[#allocation2 + $0xb0] sm:$0xff] }
  0xe2   :  { %v1488_v11 = vpop.eup %1487  ;;  %v301_v13 = vadd.f32 %v231_v9, %v173_v1  ;;  %v696_v14 = vsel %vm632_vm3, %v1486_v7, 0.0  ;;  %v606_v17 = vld [vmem:[#allocation2 + $0x48] sm:$0xff] }
  0xe3   :  { %335 = vst.msk [vmem:[#allocation2 + $0x68] sm:$0xff] %vm64_vm0, %v302_v8  ;;  %v694_v20 = vsel %vm630_vm4, %v1488_v11, 0.0  ;;  %728 = vst.msk [vmem:[%s2275_s3 + $0x18] sm:$0xff] %vm64_vm0, %v696_v14  ;;  %1497 = vrsqrt.f32 %v606_v17  ;;  %v1964_v22 = vld [vmem:[#allocation2 + $0x40] sm:$0xff]  ;;  %vm638_vm9 = vcmp.gt.f32.partialorder %v606_v17, 0.0  ;;  %v186_v8 = vld [vmem:[#allocation2 + $0xc8] sm:$0xff] }
  0xe4   :  { %1037 = vperm.xlu1 %1480, %v694_v20   ;;  %726 = vst.msk [vmem:[%s2275_s3 + $0x8] sm:$0xff] %vm64_vm0, %v694_v20  ;;  %v240_v25 = vpop.xlane.xlu1 %239  ;;  %334 = vst.msk [vmem:[#allocation2 + $0x60] sm:$0xff] %vm64_vm0, %v301_v13  ;;  %1499 = vrsqrt.f32 %v1964_v22  ;;  %vm637_vm10 = vcmp.gt.f32.partialorder %v1964_v22, 0.0 }
  0xe5   :  { %v1490_v26 = vpop.eup %1489  ;;  %v304_v29 = vadd.f32 %v240_v25, %v176_v12  ;;  %v237_v30 = vpop.xlane.xlu0 %236  ;;  %v185_v12 = vld [vmem:[#allocation2 + $0xc0] sm:$0xff] }
  0xe6   :  { %v1492_v15 = vpop.eup %1491  ;;  %v303_v32 = vadd.f32 %v237_v30, %v175_v21  ;;  %v1972_v33 = vsel %vm634_vm5, %v1490_v26, 0.0  ;;  %v608_v36 = vld [vmem:[#allocation2 + $0x58] sm:$0xff] }
  0xe7   :  { %337 = vst.msk [vmem:[#allocation2 + $0x78] sm:$0xff] %vm64_vm0, %v304_v29  ;;  %v697_v43 = vsel %vm633_vm6, %v1492_v15, 0.0  ;;  %730 = vst.msk [vmem:[%s2275_s3 + $0x28] sm:$0xff] %vm64_vm0, %v1972_v33  ;;  %1501 = vrsqrt.f32 %v608_v36  ;;  %v1981_v50 = vld [vmem:[#allocation2 + $0x50] sm:$0xff]  ;;  %vm640_vm11 = vcmp.gt.f32.partialorder %v608_v36, 0.0  ;;  %v188_v29 = vld [vmem:[#allocation2 + $0xd8] sm:$0xff] }
  0xe8   :  { %1042 = vperm.xlu1 %1480, %v695_v2   ;;  %v246_v54 = vpop.xlane.xlu1 %245  ;;  %336 = vst.msk [vmem:[#allocation2 + $0x70] sm:$0xff] %vm64_vm0, %v303_v32  ;;  %729 = vst.msk [vmem:[%s2275_s3 + $0x20] sm:$0xff] %vm64_vm0, %v697_v43  ;;  %1503 = vrsqrt.f32 %v1981_v50  ;;  %vm639_vm12 = vcmp.gt.f32.partialorder %v1981_v50, 0.0 }
  0xe9   :  { %v1494_v37 = vpop.eup %1493  ;;  %v306_v40 = vadd.f32 %v246_v54, %v178_v16  ;;  %v243_v28 = vpop.xlane.xlu0 %242  ;;  %v187_v16 = vld [vmem:[#allocation2 + $0xd0] sm:$0xff] }
  0xea   :  { %v1496_v44 = vpop.eup %1495  ;;  %v305_v23 = vadd.f32 %v243_v28, %v177_v38  ;;  %v1990_v47 = vld [vmem:[#allocation2 + $0x68] sm:$0xff]  ;;  %v1992_v51 = vsel %vm636_vm7, %v1494_v37, 0.0 }
  0xeb   :  { %339 = vst.msk [vmem:[#allocation2 + $0x88] sm:$0xff] %vm64_vm0, %v306_v40  ;;  %v1995_v48 = vsel %vm635_vm8, %v1496_v44, 0.0  ;;  %1505 = vrsqrt.f32 %v1990_v47  ;;  %732 = vst.msk [vmem:[%s2275_s3 + $0x38] sm:$0xff] %vm64_vm0, %v1992_v51  ;;  %v2003_v49 = vld [vmem:[#allocation2 + $0x60] sm:$0xff]  ;;  %vm642_vm13 = vcmp.gt.f32.partialorder %v1990_v47, 0.0  ;;  %v190_v40 = vld [vmem:[#allocation2 + $0xe8] sm:$0xff] }
  0xec   :  { %1047 = vperm.xlu1 %1480, %v696_v14   ;;  %v252_v62 = vpop.xlane.xlu1 %251  ;;  %338 = vst.msk [vmem:[#allocation2 + $0x80] sm:$0xff] %vm64_vm0, %v305_v23  ;;  %731 = vst.msk [vmem:[%s2275_s3 + $0x30] sm:$0xff] %vm64_vm0, %v1995_v48  ;;  %1507 = vrsqrt.f32 %v2003_v49  ;;  %vm641_vm14 = vcmp.gt.f32.partialorder %v2003_v49, 0.0 }
  0xed   :  { %v1498_v63 = vpop.eup %1497  ;;  %v308_v52 = vadd.f32 %v252_v62, %v180_v45  ;;  %v249_v53 = vpop.xlane.xlu0 %248  ;;  %v189_v45 = vld [vmem:[#allocation2 + $0xe0] sm:$0xff] }
  0xee   :  { %v1500_v3 = vpop.eup %1499  ;;  %v702_v5 = vsel %vm638_vm9, %v1498_v63, 0.0  ;;  %v307_v19 = vadd.f32 %v249_v53, %v179_v31  ;;  %v2014_v10 = vld [vmem:[#allocation2 + $0x78] sm:$0xff] }
  0xef   :  { %341 = vst.msk [vmem:[#allocation2 + $0x98] sm:$0xff] %vm64_vm0, %v308_v52  ;;  %734 = vst.msk [vmem:[%s2275_s3 + $0x48] sm:$0xff] %vm64_vm0, %v702_v5  ;;  %1077 = vperm.xlu0 %1479, %v702_v5   ;;  %1509 = vrsqrt.f32 %v2014_v10  ;;  %v2024_v35 = vsel %vm637_vm10, %v1500_v3, 0.0  ;;  %v2026_v41 = vld [vmem:[#allocation2 + $0x70] sm:$0xff]  ;;  %vm644_vm15 = vcmp.gt.f32.partialorder %v2014_v10, 0.0  ;;  %v192_v52 = vld [vmem:[#allocation2 + $0xf8] sm:$0xff] }
  0xf0   :  { %1052 = vperm.xlu1 %1480, %v697_v43   ;;  %v258_v42 = vpop.xlane.xlu1 %257  ;;  %340 = vst.msk [vmem:[#allocation2 + $0x90] sm:$0xff] %vm64_vm0, %v307_v19  ;;  %733 = vst.msk [vmem:[%s2275_s3 + $0x40] sm:$0xff] %vm64_vm0, %v2024_v35  ;;  %1511 = vrsqrt.f32 %v2026_v41  ;;  %vm643_vm1 = vcmp.gt.f32.partialorder %v2026_v41, 0.0  ;;  %v191_v5 = vld [vmem:[#allocation2 + $0xf0] sm:$0xff] }
  0xf1   :  { %v1502_v27 = vpop.eup %1501  ;;  %v310_v55 = vadd.f32 %v258_v42, %v182_v18  ;;  %v255_v46 = vpop.xlane.xlu0 %254 }
  0xf2   :  { %v1504_v56 = vpop.eup %1503  ;;  %v704_v57 = vsel %vm640_vm11, %v1502_v27, 0.0  ;;  %v309_v59 = vadd.f32 %v255_v46, %v181_v24  ;;  %v2036_v60 = vld [vmem:[#allocation2 + $0x88] sm:$0xff] }
  0xf3   :  { %343 = vst.msk [vmem:[#allocation2 + $0xa8] sm:$0xff] %vm64_vm0, %v310_v55  ;;  %736 = vst.msk [vmem:[%s2275_s3 + $0x58] sm:$0xff] %vm64_vm0, %v704_v57  ;;  %1087 = vperm.xlu0 %1479, %v704_v57   ;;  %1513 = vrsqrt.f32 %v2036_v60  ;;  %v2047_v0 = vsel %vm639_vm12, %v1504_v56, 0.0  ;;  %v2049_v2 = vld [vmem:[#allocation2 + $0x80] sm:$0xff]  ;;  %vm646_vm2 = vcmp.gt.f32.partialorder %v2036_v60, 0.0 }
  0xf4   :  { %1057 = vperm.xlu1 %1480, %v1972_v33   ;;  %v264_v34 = vpop.xlane.xlu1 %263  ;;  %342 = vst.msk [vmem:[#allocation2 + $0xa0] sm:$0xff] %vm64_vm0, %v309_v59  ;;  %735 = vst.msk [vmem:[%s2275_s3 + $0x50] sm:$0xff] %vm64_vm0, %v2047_v0  ;;  %1515 = vrsqrt.f32 %v2049_v2  ;;  %vm645_vm3 = vcmp.gt.f32.partialorder %v2049_v2, 0.0 }
  0xf5   :  { %v1506_v39 = vpop.eup %1505  ;;  %v312_v1 = vadd.f32 %v264_v34, %v184_v58  ;;  %v261_v4 = vpop.xlane.xlu0 %260 }
  0xf6   :  { %v1508_v6 = vpop.eup %1507  ;;  %v706_v7 = vsel %vm642_vm13, %v1506_v39, 0.0  ;;  %v311_v9 = vadd.f32 %v261_v4, %v183_v61  ;;  %v2060_v11 = vld [vmem:[#allocation2 + $0x98] sm:$0xff] }
  0xf7   :  { %345 = vst.msk [vmem:[#allocation2 + $0xb8] sm:$0xff] %vm64_vm0, %v312_v1  ;;  %738 = vst.msk [vmem:[%s2275_s3 + $0x68] sm:$0xff] %vm64_vm0, %v706_v7  ;;  %1097 = vperm.xlu0 %1479, %v706_v7   ;;  %1517 = vrsqrt.f32 %v2060_v11  ;;  %v2071_v13 = vsel %vm641_vm14, %v1508_v6, 0.0  ;;  %v2073_v14 = vld [vmem:[#allocation2 + $0x90] sm:$0xff]  ;;  %vm648_vm4 = vcmp.gt.f32.partialorder %v2060_v11, 0.0 }
  0xf8   :  { %1062 = vperm.xlu1 %1480, %v1995_v48   ;;  %v270_v17 = vpop.xlane.xlu1 %269  ;;  %344 = vst.msk [vmem:[#allocation2 + $0xb0] sm:$0xff] %vm64_vm0, %v311_v9  ;;  %737 = vst.msk [vmem:[%s2275_s3 + $0x60] sm:$0xff] %vm64_vm0, %v2071_v13  ;;  %1519 = vrsqrt.f32 %v2073_v14  ;;  %vm647_vm5 = vcmp.gt.f32.partialorder %v2073_v14, 0.0 }
  0xf9   :  { %v1510_v20 = vpop.eup %1509  ;;  %v314_v21 = vadd.f32 %v270_v17, %v186_v8  ;;  %v267_v22 = vpop.xlane.xlu0 %266 }
  0xfa   :  { %v1512_v25 = vpop.eup %1511  ;;  %v708_v26 = vsel %vm644_vm15, %v1510_v20, 0.0  ;;  %v313_v30 = vadd.f32 %v267_v22, %v185_v12  ;;  %v2084_v15 = vld [vmem:[#allocation2 + $0xa8] sm:$0xff] }
  0xfb   :  { %347 = vst.msk [vmem:[#allocation2 + $0xc8] sm:$0xff] %vm64_vm0, %v314_v21  ;;  %740 = vst.msk [vmem:[%s2275_s3 + $0x78] sm:$0xff] %vm64_vm0, %v708_v26  ;;  %1107 = vperm.xlu0 %1479, %v708_v26   ;;  %1521 = vrsqrt.f32 %v2084_v15  ;;  %v2095_v32 = vsel %vm643_vm1, %v1512_v25, 0.0  ;;  %v2097_v33 = vld [vmem:[#allocation2 + $0xa0] sm:$0xff]  ;;  %vm650_vm6 = vcmp.gt.f32.partialorder %v2084_v15, 0.0 }
  0xfc   :  { %1067 = vperm.xlu1 %1480, %v1992_v51   ;;  %v276_v36 = vpop.xlane.xlu1 %275  ;;  %346 = vst.msk [vmem:[#allocation2 + $0xc0] sm:$0xff] %vm64_vm0, %v313_v30  ;;  %739 = vst.msk [vmem:[%s2275_s3 + $0x70] sm:$0xff] %vm64_vm0, %v2095_v32  ;;  %1523 = vrsqrt.f32 %v2097_v33  ;;  %vm649_vm7 = vcmp.gt.f32.partialorder %v2097_v33, 0.0 }
  0xfd   :  { %v1514_v38 = vpop.eup %1513  ;;  %v316_v43 = vadd.f32 %v276_v36, %v188_v29  ;;  %v273_v50 = vpop.xlane.xlu0 %272 }
  0xfe   :  { %v1516_v54 = vpop.eup %1515  ;;  %v710_v37 = vsel %vm646_vm2, %v1514_v38, 0.0  ;;  %v315_v28 = vadd.f32 %v273_v50, %v187_v16  ;;  %v620_v44 = vld [vmem:[#allocation2 + $0xb8] sm:$0xff] }
  0xff   :  { %349 = vst.msk [vmem:[#allocation2 + $0xd8] sm:$0xff] %vm64_vm0, %v316_v43  ;;  %742 = vst.msk [vmem:[%s2275_s3 + $0x88] sm:$0xff] %vm64_vm0, %v710_v37  ;;  %1117 = vperm.xlu0 %1479, %v710_v37   ;;  %1525 = vrsqrt.f32 %v620_v44  ;;  %v2116_v23 = vsel %vm645_vm3, %v1516_v54, 0.0  ;;  %v619_v47 = vld [vmem:[#allocation2 + $0xb0] sm:$0xff]  ;;  %vm652_vm8 = vcmp.gt.f32.partialorder %v620_v44, 0.0 }
 0x100   :  { %1072 = vperm.xlu1 %1480, %v2024_v35   ;;  %v282_v51 = vpop.xlane.xlu1 %281  ;;  %348 = vst.msk [vmem:[#allocation2 + $0xd0] sm:$0xff] %vm64_vm0, %v315_v28  ;;  %741 = vst.msk [vmem:[%s2275_s3 + $0x80] sm:$0xff] %vm64_vm0, %v2116_v23  ;;  %1527 = vrsqrt.f32 %v619_v47  ;;  %vm651_vm9 = vcmp.gt.f32.partialorder %v619_v47, 0.0 }
 0x101   :  { %v1518_v31 = vpop.eup %1517  ;;  %v318_v48 = vadd.f32 %v282_v51, %v190_v40  ;;  %v279_v49 = vpop.xlane.xlu0 %278 }
 0x102   :  { %v1520_v62 = vpop.eup %1519  ;;  %v712_v63 = vsel %vm648_vm4, %v1518_v31, 0.0  ;;  %v317_v53 = vadd.f32 %v279_v49, %v189_v45  ;;  %v622_v3 = vld [vmem:[#allocation2 + $0xc8] sm:$0xff] }
 0x103   :  { %351 = vst.msk [vmem:[#allocation2 + $0xe8] sm:$0xff] %vm64_vm0, %v318_v48  ;;  %744 = vst.msk [vmem:[%s2275_s3 + $0x98] sm:$0xff] %vm64_vm0, %v712_v63  ;;  %1127 = vperm.xlu0 %1479, %v712_v63   ;;  %1529 = vrsqrt.f32 %v622_v3  ;;  %v711_v18 = vsel %vm647_vm5, %v1520_v62, 0.0  ;;  %v621_v19 = vld [vmem:[#allocation2 + $0xc0] sm:$0xff]  ;;  %vm654_vm10 = vcmp.gt.f32.partialorder %v622_v3, 0.0 }
 0x104   :  { %1082 = vperm.xlu1 %1480, %v2047_v0   ;;  %v288_v10 = vpop.xlane.xlu1 %287  ;;  %350 = vst.msk [vmem:[#allocation2 + $0xe0] sm:$0xff] %vm64_vm0, %v317_v53  ;;  %743 = vst.msk [vmem:[%s2275_s3 + $0x90] sm:$0xff] %vm64_vm0, %v711_v18  ;;  %1531 = vrsqrt.f32 %v621_v19  ;;  %vm653_vm11 = vcmp.gt.f32.partialorder %v621_v19, 0.0 }
 0x105   :  { %v1522_v24 = vpop.eup %1521  ;;  %v320_v35 = vadd.f32 %v288_v10, %v192_v52  ;;  %v285_v41 = vpop.xlane.xlu0 %284 }
 0x106   :  { %v1524_v42 = vpop.eup %1523  ;;  %v714_v27 = vsel %vm650_vm6, %v1522_v24, 0.0  ;;  %v319_v55 = vadd.f32 %v285_v41, %v191_v5  ;;  %v624_v46 = vld [vmem:[#allocation2 + $0xd8] sm:$0xff] }
 0x107   :  { %353 = vst.msk [vmem:[#allocation2 + $0xf8] sm:$0xff] %vm64_vm0, %v320_v35  ;;  %746 = vst.msk [vmem:[%s2275_s3 + $0xa8] sm:$0xff] %vm64_vm0, %v714_v27  ;;  %1137 = vperm.xlu0 %1479, %v714_v27   ;;  %1533 = vrsqrt.f32 %v624_v46  ;;  %v713_v56 = vsel %vm649_vm7, %v1524_v42, 0.0  ;;  %v623_v57 = vld [vmem:[#allocation2 + $0xd0] sm:$0xff]  ;;  %vm656_vm12 = vcmp.gt.f32.partialorder %v624_v46, 0.0 }
 0x108   :  { %1092 = vperm.xlu1 %1480, %v2071_v13   ;;  %352 = vst.msk [vmem:[#allocation2 + $0xf0] sm:$0xff] %vm64_vm0, %v319_v55  ;;  %745 = vst.msk [vmem:[%s2275_s3 + $0xa0] sm:$0xff] %vm64_vm0, %v713_v56  ;;  %1535 = vrsqrt.f32 %v623_v57  ;;  %vm655_vm13 = vcmp.gt.f32.partialorder %v623_v57, 0.0 }
 0x109   :  { %v1526_v58 = vpop.eup %1525 }
 0x10a   :  { %v1528_v59 = vpop.eup %1527  ;;  %v716_v60 = vsel %vm652_vm8, %v1526_v58, 0.0  ;;  %v626_v61 = vld [vmem:[#allocation2 + $0xe8] sm:$0xff] }
 0x10b   :  { %748 = vst.msk [vmem:[%s2275_s3 + $0xb8] sm:$0xff] %vm64_vm0, %v716_v60  ;;  %1147 = vperm.xlu0 %1479, %v716_v60   ;;  %1537 = vrsqrt.f32 %v626_v61  ;;  %v715_v0 = vsel %vm651_vm9, %v1528_v59, 0.0  ;;  %v625_v2 = vld [vmem:[#allocation2 + $0xe0] sm:$0xff]  ;;  %vm658_vm14 = vcmp.gt.f32.partialorder %v626_v61, 0.0 }
 0x10c   :  { %1102 = vperm.xlu1 %1480, %v2095_v32   ;;  %747 = vst.msk [vmem:[%s2275_s3 + $0xb0] sm:$0xff] %vm64_vm0, %v715_v0  ;;  %1539 = vrsqrt.f32 %v625_v2  ;;  %vm657_vm15 = vcmp.gt.f32.partialorder %v625_v2, 0.0 }
 0x10d   :  { %v1530_v34 = vpop.eup %1529 }
 0x10e   :  { %v1532_v39 = vpop.eup %1531  ;;  %v718_v1 = vsel %vm654_vm10, %v1530_v34, 0.0  ;;  %v628_v4 = vld [vmem:[#allocation2 + $0xf8] sm:$0xff] }
 0x10f   :  { %750 = vst.msk [vmem:[%s2275_s3 + $0xc8] sm:$0xff] %vm64_vm0, %v718_v1  ;;  %1157 = vperm.xlu0 %1479, %v718_v1   ;;  %1541 = vrsqrt.f32 %v628_v4  ;;  %v717_v6 = vsel %vm653_vm11, %v1532_v39, 0.0  ;;  %v627_v7 = vld [vmem:[#allocation2 + $0xf0] sm:$0xff]  ;;  %vm660_vm1 = vcmp.gt.f32.partialorder %v628_v4, 0.0 }
 0x110   :  { %1112 = vperm.xlu1 %1480, %v2116_v23   ;;  %749 = vst.msk [vmem:[%s2275_s3 + $0xc0] sm:$0xff] %vm64_vm0, %v717_v6  ;;  %1543 = vrsqrt.f32 %v627_v7  ;;  %vm659_vm2 = vcmp.gt.f32.partialorder %v627_v7, 0.0 }
 0x111   :  { %v1534_v8 = vpop.eup %1533 }
 0x112   :  { %v1536_v9 = vpop.eup %1535  ;;  %v720_v11 = vsel %vm656_vm12, %v1534_v8, 0.0 }
 0x113   :  { %752 = vst.msk [vmem:[%s2275_s3 + $0xd8] sm:$0xff] %vm64_vm0, %v720_v11  ;;  %1167 = vperm.xlu0 %1479, %v720_v11   ;;  %v719_v12 = vsel %vm655_vm13, %v1536_v9, 0.0 }
 0x114   :  { %1122 = vperm.xlu1 %1480, %v711_v18   ;;  %751 = vst.msk [vmem:[%s2275_s3 + $0xd0] sm:$0xff] %vm64_vm0, %v719_v12 }
 0x115   :  { %v1538_v13 = vpop.eup %1537 }
 0x116   :  { %v1540_v14 = vpop.eup %1539  ;;  %v722_v17 = vsel %vm658_vm14, %v1538_v13, 0.0 }
 0x117   :  { %754 = vst.msk [vmem:[%s2275_s3 + $0xe8] sm:$0xff] %vm64_vm0, %v722_v17  ;;  %1177 = vperm.xlu0 %1479, %v722_v17   ;;  %v721_v20 = vsel %vm657_vm15, %v1540_v14, 0.0 }
 0x118   :  { %1132 = vperm.xlu1 %1480, %v713_v56   ;;  %753 = vst.msk [vmem:[%s2275_s3 + $0xe0] sm:$0xff] %vm64_vm0, %v721_v20 }
 0x119   :  { %v1542_v21 = vpop.eup %1541 }
 0x11a   :  { %v1544_v22 = vpop.eup %1543  ;;  %v724_v25 = vsel %vm660_vm1, %v1542_v21, 0.0 }
 0x11b   :  { %756 = vst.msk [vmem:[%s2275_s3 + $0xf8] sm:$0xff] %vm64_vm0, %v724_v25  ;;  %1187 = vperm.xlu0 %1479, %v724_v25   ;;  %v723_v26 = vsel %vm659_vm2, %v1544_v22, 0.0 }
 0x11c   :  { %1142 = vperm.xlu1 %1480, %v715_v0   ;;  %755 = vst.msk [vmem:[%s2275_s3 + $0xf0] sm:$0xff] %vm64_vm0, %v723_v26 }
 0x120   :  { %1152 = vperm.xlu1 %1480, %v717_v6  }
 0x124   :  { %1162 = vperm.xlu1 %1480, %v719_v12  }
 0x128   :  { %1172 = vperm.xlu1 %1480, %v721_v20  }
 0x12c   :  { %1182 = vperm.xlu1 %1480, %v723_v26  }
 0x12d   :  { %1622 = shalt.err (!%p1619_p0)
}
 0x12e   :  { %s1623_s6 = scalar_lea.hbm %s2277_s5, 2048 }
 0x12f   :  { %p1624_p1 = scmp.ne.s32.totalorder %s2277_s5, %s1623_s6  ;;  %p1627_p2 = scmp.lt.u32.totalorder %s1623_s6, %s2277_s5 }
 0x131   :  { %p1629_p3 = pnand %p1627_p2, %p1624_p1 }
 0x133   :  { %1632 = shalt.err (!%p1629_p3)
}
 0x134   :  { %1279 = dma.vmem_to_hbm [thread:$0]  %s1274_s25, 2048, %s2277_s5, [#allocation11], %s1667_s1, %s1667_s1, %s1668_s17  }
 0x135   :  { %s1673_s5 = smov [#allocation9]  }
 0x136   :  { %s1261_s1 = sshll.u32 %s1673_s5, 4  ;;  %s1262_s1 = int_to_ptr.vmem [resolvable:$true] %s1261_s1 }
 0x137   :  { %s1633_s17 = scalar_lea.vmem %s1262_s1, 2048  ;;  %p1638_p5 = scmp.lt.s32.totalorder %s1262_s1, %s1262_s1 }
 0x138   :  { %p1634_p4 = scmp.ne.s32.totalorder %s1262_s1, %s1633_s17  ;;  %p1639_p6 = scmp.lt.s32.totalorder %s1633_s17, %s1633_s17 }
 0x13a   :  { %p1640_p7 = por %p1639_p6, %p1638_p5 }
 0x13c   :  { %p1641_p8 = pnand %p1640_p7, %p1634_p4 }
 0x145   :  { %v1374_v29 = vpop.f32.mrb[0].mxu0 }
 0x146   :  { %v871_v30 = vpop.f32.mrb[1].mxu0 }
 0x147   :  { %v2209_v15 = vpop.f32.mrb[0].mxu1 }
 0x148   :  { %v2211_v16 = vpop.f32.mrb[1].mxu1 }
 0x149   :  { %v1377_v32 = vpop.f32.mrb[2].mxu0 }
 0x14a   :  { %v881_v33 = vpop.f32.mrb[3].mxu0 }
 0x14b   :  { %v2213_v36 = vpop.f32.mrb[2].mxu1 }
 0x14c   :  { %v2215_v38 = vpop.f32.mrb[3].mxu1 }
 0x14d   :  { %v1380_v43 = vpop.f32.mrb[4].mxu0 }
 0x14e   :  { %v891_v50 = vpop.f32.mrb[5].mxu0 }
 0x14f   :  { %v2217_v54 = vpop.f32.mrb[4].mxu1 }
 0x150   :  { %v2219_v37 = vpop.f32.mrb[5].mxu1 }
 0x151   :  { %v1383_v40 = vpop.f32.mrb[6].mxu0 }
 0x152   :  { %v901_v28 = vpop.f32.mrb[7].mxu0 }
 0x153   :  { %v2221_v44 = vpop.f32.mrb[6].mxu1 }
 0x154   :  { %v2223_v45 = vpop.f32.mrb[7].mxu1 }
 0x155   :  { %v1386_v23 = vpop.f32.mrb[8].mxu0 }
 0x156   :  { %v911_v47 = vpop.f32.mrb[9].mxu0 }
 0x157   :  { %v2225_v51 = vpop.f32.mrb[8].mxu1 }
 0x158   :  { %v2227_v31 = vpop.f32.mrb[9].mxu1 }
 0x159   :  { %v1389_v48 = vpop.f32.mrb[10].mxu0 }
 0x15a   :  { %v921_v49 = vpop.f32.mrb[11].mxu0 }
 0x15b   :  { %v2229_v62 = vpop.f32.mrb[10].mxu1 }
 0x15c   :  { %v2231_v63 = vpop.f32.mrb[11].mxu1 }
 0x15d   :  { %v1392_v52 = vpop.f32.mrb[12].mxu0 }
 0x15e   :  { %v931_v53 = vpop.f32.mrb[13].mxu0 }
 0x15f   :  { %v2233_v3 = vpop.f32.mrb[12].mxu1  ;;  %v1033_v5 = vpop.permute.xlu0 %1032 }
 0x160   :  { %v2235_v18 = vpop.f32.mrb[13].mxu1  ;;  %v1190_v35 = vmul.f32 %v1033_v5, %v871_v30 }
 0x161   :  { %v1395_v19 = vpop.f32.mrb[14].mxu0 }
 0x162   :  { %v941_v24 = vpop.f32.mrb[15].mxu0 }
 0x163   :  { %v1038_v10 = vpop.permute.xlu1 %1037  ;;  %v2237_v42 = vpop.f32.mrb[14].mxu1 }
 0x164   :  { %v1191_v41 = vmul.f32 %v1374_v29, %v1038_v10  ;;  %v2239_v27 = vpop.f32.mrb[15].mxu1 }
 0x166   :  { %v1222_v55 = vpack.c.bf16 %v1191_v41, %v1190_v35 }
 0x167   :  { %v1043_v46 = vpop.permute.xlu1 %1042 }
 0x168   :  { %1238 = vst [vmem:[#allocation9] sm:$0xff] %v1222_v55  ;;  %v1192_v57 = vmul.f32 %v1043_v46, %v881_v33 }
 0x16b   :  { %v1048_v56 = vpop.permute.xlu1 %1047 }
 0x16c   :  { %v1193_v58 = vmul.f32 %v1377_v32, %v1048_v56 }
 0x16e   :  { %v1223_v59 = vpack.c.bf16 %v1193_v58, %v1192_v57  ;;  %v1078_v60 = vpop.permute.xlu0 %1077 }
 0x16f   :  { %v1053_v61 = vpop.permute.xlu1 %1052  ;;  %v1199_v17 = vmul.f32 %v1386_v23, %v1078_v60 }
 0x170   :  { %1239 = vst [vmem:[#allocation9 + $0x8] sm:$0xff] %v1223_v59  ;;  %v1194_v34 = vmul.f32 %v1053_v61, %v891_v50 }
 0x172   :  { %v1088_v0 = vpop.permute.xlu0 %1087 }
 0x173   :  { %v1058_v2 = vpop.permute.xlu1 %1057  ;;  %v1201_v25 = vmul.f32 %v1389_v48, %v1088_v0 }
 0x174   :  { %v1195_v39 = vmul.f32 %v1380_v43, %v1058_v2 }
 0x176   :  { %v1224_v1 = vpack.c.bf16 %v1195_v39, %v1194_v34  ;;  %v1098_v4 = vpop.permute.xlu0 %1097 }
 0x177   :  { %v1063_v6 = vpop.permute.xlu1 %1062  ;;  %v1203_v33 = vmul.f32 %v1392_v52, %v1098_v4 }
 0x178   :  { %1240 = vst [vmem:[#allocation9 + $0x10] sm:$0xff] %v1224_v1  ;;  %v1196_v9 = vmul.f32 %v1063_v6, %v901_v28 }
 0x17a   :  { %v1108_v7 = vpop.permute.xlu0 %1107 }
 0x17b   :  { %v1068_v8 = vpop.permute.xlu1 %1067  ;;  %v1205_v5 = vmul.f32 %v1395_v19, %v1108_v7 }
 0x17c   :  { %v1197_v11 = vmul.f32 %v1383_v40, %v1068_v8 }
 0x17e   :  { %v1225_v12 = vpack.c.bf16 %v1197_v11, %v1196_v9  ;;  %v1118_v14 = vpop.permute.xlu0 %1117 }
 0x17f   :  { %v1073_v13 = vpop.permute.xlu1 %1072 }
 0x180   :  { %1241 = vst [vmem:[#allocation9 + $0x18] sm:$0xff] %v1225_v12  ;;  %v1198_v20 = vmul.f32 %v1073_v13, %v911_v47  ;;  %v1207_v47 = vmul.f32 %v2209_v15, %v1118_v14 }
 0x182   :  { %v1226_v21 = vpack.c.bf16 %v1199_v17, %v1198_v20  ;;  %v1128_v29 = vpop.permute.xlu0 %1127 }
 0x183   :  { %v1083_v22 = vpop.permute.xlu1 %1082  ;;  %v1209_v52 = vmul.f32 %v2213_v36, %v1128_v29 }
 0x184   :  { %1242 = vst [vmem:[#allocation9 + $0x20] sm:$0xff] %v1226_v21  ;;  %v1200_v26 = vmul.f32 %v1083_v22, %v921_v49 }
 0x186   :  { %v1227_v30 = vpack.c.bf16 %v1201_v25, %v1200_v26  ;;  %v1138_v28 = vpop.permute.xlu0 %1137 }
 0x187   :  { %v1093_v32 = vpop.permute.xlu1 %1092 }
 0x188   :  { %1243 = vst [vmem:[#allocation9 + $0x28] sm:$0xff] %v1227_v30  ;;  %v1202_v43 = vmul.f32 %v1093_v32, %v931_v53 }
 0x18a   :  { %v1228_v50 = vpack.c.bf16 %v1203_v33, %v1202_v43  ;;  %v1148_v49 = vpop.permute.xlu0 %1147 }
 0x18b   :  { %v1103_v40 = vpop.permute.xlu1 %1102 }
 0x18c   :  { %1244 = vst [vmem:[#allocation9 + $0x30] sm:$0xff] %v1228_v50  ;;  %v1204_v10 = vmul.f32 %v1103_v40, %v941_v24  ;;  %v1211_v24 = vmul.f32 %v2217_v54, %v1138_v28 }
 0x18e   :  { %v1229_v23 = vpack.c.bf16 %v1205_v5, %v1204_v10  ;;  %v1158_v56 = vpop.permute.xlu0 %1157 }
 0x18f   :  { %v1113_v35 = vpop.permute.xlu1 %1112 }
 0x190   :  { %1245 = vst [vmem:[#allocation9 + $0x38] sm:$0xff] %v1229_v23  ;;  %v1206_v48 = vmul.f32 %v1113_v35, %v2211_v16  ;;  %v1213_v16 = vmul.f32 %v2221_v44, %v1148_v49 }
 0x192   :  { %v1230_v41 = vpack.c.bf16 %v1207_v47, %v1206_v48  ;;  %v1168_v60 = vpop.permute.xlu0 %1167 }
 0x193   :  { %v1123_v55 = vpop.permute.xlu1 %1122 }
 0x194   :  { %1246 = vst [vmem:[#allocation9 + $0x40] sm:$0xff] %v1230_v41  ;;  %v1208_v53 = vmul.f32 %v1123_v55, %v2215_v38  ;;  %v1215_v38 = vmul.f32 %v2225_v51, %v1158_v56 }
 0x196   :  { %v1231_v46 = vpack.c.bf16 %v1209_v52, %v1208_v53  ;;  %v1178_v54 = vpop.permute.xlu0 %1177 }
 0x197   :  { %v1133_v19 = vpop.permute.xlu1 %1132 }
 0x198   :  { %1247 = vst [vmem:[#allocation9 + $0x48] sm:$0xff] %v1231_v46  ;;  %v1210_v57 = vmul.f32 %v1133_v19, %v2219_v37  ;;  %v1217_v37 = vmul.f32 %v2229_v62, %v1168_v60 }
 0x19a   :  { %v1232_v15 = vpack.c.bf16 %v1211_v24, %v1210_v57  ;;  %v1188_v6 = vpop.permute.xlu0 %1187 }
 0x19b   :  { %v1143_v58 = vpop.permute.xlu1 %1142 }
 0x19c   :  { %1248 = vst [vmem:[#allocation9 + $0x50] sm:$0xff] %v1232_v15  ;;  %v1212_v59 = vmul.f32 %v1143_v58, %v2223_v45  ;;  %v1219_v45 = vmul.f32 %v2233_v3, %v1178_v54 }
 0x19e   :  { %v1233_v36 = vpack.c.bf16 %v1213_v16, %v1212_v59 }
 0x19f   :  { %v1153_v61 = vpop.permute.xlu1 %1152 }
 0x1a0   :  { %1249 = vst [vmem:[#allocation9 + $0x58] sm:$0xff] %v1233_v36  ;;  %v1214_v0 = vmul.f32 %v1153_v61, %v2227_v31  ;;  %v1221_v31 = vmul.f32 %v2237_v42, %v1188_v6 }
 0x1a2   :  { %v1234_v2 = vpack.c.bf16 %v1215_v38, %v1214_v0 }
 0x1a3   :  { %v1163_v34 = vpop.permute.xlu1 %1162 }
 0x1a4   :  { %1250 = vst [vmem:[#allocation9 + $0x60] sm:$0xff] %v1234_v2  ;;  %v1216_v39 = vmul.f32 %v1163_v34, %v2231_v63 }
 0x1a6   :  { %v1235_v44 = vpack.c.bf16 %v1217_v37, %v1216_v39 }
 0x1a7   :  { %v1173_v1 = vpop.permute.xlu1 %1172 }
 0x1a8   :  { %1251 = vst [vmem:[#allocation9 + $0x68] sm:$0xff] %v1235_v44  ;;  %v1218_v4 = vmul.f32 %v1173_v1, %v2235_v18 }
 0x1aa   :  { %v1236_v51 = vpack.c.bf16 %v1219_v45, %v1218_v4 }
 0x1ab   :  { %v1183_v7 = vpop.permute.xlu1 %1182 }
 0x1ac   :  { %1252 = vst [vmem:[#allocation9 + $0x70] sm:$0xff] %v1236_v51  ;;  %v1220_v62 = vmul.f32 %v1183_v7, %v2239_v27 }
 0x1ae   :  { %v1237_v8 = vpack.c.bf16 %v1221_v31, %v1220_v62 }
 0x1b0   :  { %1253 = vst [vmem:[#allocation9 + $0x78] sm:$0xff] %v1237_v8 }
 0x1b1   :  { %1644 = shalt.err (!%p1641_p8)
}
 0x1b2   :  { %s1645_s12 = scalar_lea.hbm %s2276_s4, 2048 }
 0x1b3   :  { %p1646_p9 = scmp.ne.s32.totalorder %s2276_s4, %s1645_s12  ;;  %p1649_p10 = scmp.lt.u32.totalorder %s1645_s12, %s2276_s4 }
 0x1b5   :  { %p1651_p11 = pnand %p1649_p10, %p1646_p9 }
 0x1b7   :  { %1654 = shalt.err (!%p1651_p11)
}
 0x1b8   :  { %1267 = dma.vmem_to_hbm [thread:$0]  %s1262_s1, 2048, %s2276_s4, [#allocation5], %s1664_s28, %s1664_s28, %s1665_s29  }
 0x1b9   :  { %1659 = dma.done.wait [#allocation5], 2048  }
 0x1ba   :  { %1660 = vsyncadd [#allocation5], 4294965248 }
 0x1bb   :  { %1661 = dma.done.wait [#allocation11], 2048  }
 0x1bc   :  { %1662 = vsyncadd [#allocation11], 4294965248 }
 0x1bd   :  { %1288 = vsyncpa [#allocation4], 1 }
 0x1be   :  { %1289 = vsyncpa [#allocation7], 1 }
 0x1bf   :  { %1290 = vsyncpa [#allocation5], 1 }
 0x1c0   :  { %1291 = vsyncpa [#allocation11], 1 }

</bundles_post_ra>
